<compile_context>
chip_gen: v6e
topology: v6e:2x2x1
jax: 0.10.0
libtpu: 0.0.40
codegen_flags: <defaults>
</compile_context>

<pallas_src>
import jax
import jax.numpy as jnp
from jax import lax
from jax.experimental import pallas as pl
from jax.experimental.pallas import tpu as pltpu

F32 = jnp.float32
BF16 = jnp.bfloat16

# ---------------- scaled-down configuration ----------------
B = 2                   # batch
IMG = 64                # input image size       (torch: 224/512)
C2 = 32                 # stride-8 channels      (torch: 512)
C3 = 64                 # stride-16 channels     (torch: 1024) == CGD feature_dim
D = 64                  # hidden_dim             (torch: 1024)
HC = 32                 # local-branch hidden_channel (torch: 2048)
HC4 = HC // 4           # per-branch channels (8)
DILATIONS = (3, 6, 9)
OUT_DIM = 32            # output_dim             (torch: 512)
H8 = W8 = IMG // 8      # 8
H16 = W16 = IMG // 16   # 4
S = H8 * W8             # 64 spatial positions at stride 8
S16 = H16 * W16         # 16 spatial positions at stride 16
M = B * S               # 128 rows for the local branch
PAD = max(DILATIONS)    # single padding covering every dilation
K9 = 9 * C2             # im2col K per dilation (288)
K_DIL = 3 * K9          # merged matmul K over the three dilations (864)


# ======================= fused Pallas kernel =======================

def _cgdolg_kernel(xcat_ref, gmean_ref, x16_ref,
                   wbd_ref, bdil_ref, wgap_ref, bgap_ref,
                   w1d_ref, w1g_ref, b1_ref,
                   w2_ref, g2_ref, be2_ref,
                   w3_ref, b3_ref,
                   wcgd_ref, wfc1_ref, bfc1_ref,
                   wfc2_ref, bfc2_ref,
                   out_ref):
    # ---------- MultiAtrous dilated branches: one merged block-diag matmul ----------
    # x_cat is a precomputed lane-dense im2col [M, K_DIL] (bf16), wbd block-diagonal.
    ma = jnp.dot(xcat_ref[...], wbd_ref[...],
                 preferred_element_type=jnp.float32) + bdil_ref[...]      # [M, 3*HC4]

    # GAP branch: spatial mean (precomputed) -> 1x1 conv -> ReLU (bilinear upsample
    # of a 1x1 map is a constant broadcast, folded below).
    gap = jnp.maximum(
        jnp.dot(gmean_ref[...].astype(BF16), wgap_ref[...],
                preferred_element_type=jnp.float32) + bgap_ref[...], 0.0)  # [B, HC4]

    # conv1x1_1 split linearly over [dilated | gap] channel blocks, then ReLU.
    lf = jnp.dot(ma.astype(BF16), w1d_ref[...],
                 preferred_element_type=jnp.float32)                       # [M, D]
    lf_gap = jnp.dot(gap.astype(BF16), w1g_ref[...],
                     preferred_element_type=jnp.float32)                   # [B, D]
    lf = lf + jnp.broadcast_to(lf_gap[:, None, :], (B, S, D)).reshape(M, D)
    lf = jnp.maximum(lf + b1_ref[...], 0.0)

    # conv1x1_2 (bias=False)
    lf = jnp.dot(lf.astype(BF16), w2_ref[...], preferred_element_type=jnp.float32)

    # BatchNorm2d (training-mode batch stats over B*H*W, biased var, eps=1e-5)
    mu = jnp.mean(lf, axis=0, keepdims=True)
    var = jnp.mean((lf - mu) * (lf - mu), axis=0, keepdims=True)
    bn = (lf - mu) * (g2_ref[...] * lax.rsqrt(var + 1e-5)) + be2_ref[...]

    # attention: ReLU -> conv1x1_3 -> Softplus(beta=1, threshold=20)
    att = jnp.dot(jnp.maximum(bn, 0.0).astype(BF16), w3_ref[...],
                  preferred_element_type=jnp.float32) + b3_ref[...]
    att = jnp.where(att > 20.0, att,
                    jnp.log(1.0 + jnp.exp(jnp.minimum(att, 20.0))))

    # F.normalize over channels (rsqrt on the EUP), then attention multiply
    inv_nrm = lax.rsqrt(jnp.maximum(jnp.sum(bn * bn, axis=-1, keepdims=True), 1e-24))
    local = bn * inv_nrm * att                                             # [M, D]

    # ---------- CGD2 ('SG') on the stride-16 features (batched, no per-b loops) ----------
    def l2n(v):
        return v * lax.rsqrt(jnp.maximum(jnp.sum(v * v, axis=-1, keepdims=True), 1e-24))

    x16 = x16_ref[...].reshape(B, S16, C3)                                 # [B, S16, C3]
    gd_s = jnp.mean(x16, axis=1)                                           # p = 1 (mean)
    xc = jnp.maximum(x16, 1e-6)                                            # p = 3 (GeM)
    m3 = jnp.mean(xc * xc * xc, axis=1)
    gd_g = jnp.exp(jnp.log(m3) * (1.0 / 3.0))                              # m3 > 0

    gcat = jnp.concatenate([l2n(gd_s), l2n(gd_g)], axis=-1)                # [B, 2*C3]
    cgd = l2n(jnp.dot(gcat.astype(BF16), wcgd_ref[...],
                      preferred_element_type=jnp.float32))                 # Linear(no bias)+norm
    g = jnp.dot(cgd.astype(BF16), wfc1_ref[...],
                preferred_element_type=jnp.float32) + bfc1_ref[...]        # fc_1 -> [B, D]

    # ---------- OrthogonalFusion + AdaptiveAvgPool2d(1) + fc_2 ----------
    local3 = local.reshape(B, S, D)
    # torch divides by ||g||^2 with no eps; reciprocal goes to the EUP.
    inv_gn2 = pl.reciprocal(jnp.sum(g * g, axis=-1, keepdims=True), approx=True)  # [B, 1]
    coeff = jnp.sum(local3 * g[:, None, :], axis=-1, keepdims=True)               # [B, S, 1]
    orth = local3 - (coeff * inv_gn2[:, None, :]) * g[:, None, :]
    # GAP of cat([global (broadcast), orth]) == cat([global, spatial-mean(orth)])
    orth_gap = jnp.mean(orth, axis=1)                                      # [B, D]
    feat_gap = jnp.concatenate([g, orth_gap], axis=-1)                     # [B, 2*D]
    out_ref[...] = (jnp.dot(feat_gap.astype(BF16), wfc2_ref[...],
                            preferred_element_type=jnp.float32)
                    + bfc2_ref[...]).astype(out_ref.dtype)                 # fc_2


def _full(shape):
    nd = len(shape)
    return pl.BlockSpec(shape, lambda i, _nd=nd: (0,) * _nd)


def cgdolg_head(feat8, feat16, p):
    """Everything after the backbone, as one pallas_call."""
    # ---- im2col for the three dilated 3x3 convs, hoisted into the wrapper ----
    x8p = jnp.pad(feat8, ((0, 0), (PAD, PAD), (PAD, PAD), (0, 0)))
    cols = []
    for d in DILATIONS:                                      # padding == dilation
        for kh in range(3):
            for kw in range(3):
                sh = PAD + (kh - 1) * d
                sw = PAD + (kw - 1) * d
                cols.append(lax.slice(x8p, (0, sh, sw, 0), (B, sh + H8, sw + W8, C2)))
    x_cat = jnp.concatenate(cols, axis=-1).reshape(M, K_DIL).astype(BF16)  # [128, 864]

    # GAP-branch input: spatial mean of the stride-8 map
    gmean = jnp.mean(feat8.reshape(B, S, C2), axis=1)                      # [B, C2]

    # block-diagonal merged weight over the three dilations only
    wbd = jnp.zeros((K_DIL, 3 * HC4), F32)
    for i, d in enumerate(DILATIONS):
        wbd = wbd.at[i * K9:(i + 1) * K9, i * HC4:(i + 1) * HC4].set(
            p[f"dil{d}_w"].reshape(K9, HC4))                 # (kh, kw, cin) row order
    bdil = jnp.concatenate([p[f"dil{d}_b"] for d in DILATIONS]).reshape(1, 3 * HC4)

    w1 = p["c11_1_w"]                                        # [HC, D]; rows = [dil | gap]
    args = [
        x_cat, gmean, feat16,
        wbd.astype(BF16), bdil,
        p["gapbr_w"].astype(BF16), p["gapbr_b"].reshape(1, HC4),
        w1[:3 * HC4, :].astype(BF16), w1[3 * HC4:, :].astype(BF16),
        p["c11_1_b"].reshape(1, D),
        p["c11_2_w"].astype(BF16),
        p["bn2_gamma"].reshape(1, D), p["bn2_beta"].reshape(1, D),
        p["c11_3_w"].astype(BF16), p["c11_3_b"].reshape(1, D),
        p["cgd_w"].astype(BF16),
        p["fc1_w"].astype(BF16), p["fc1_b"].reshape(1, D),
        p["fc2_w"].astype(BF16), p["fc2_b"].reshape(1, OUT_DIM),
    ]
    return pl.pallas_call(
        _cgdolg_kernel,
        out_shape=jax.ShapeDtypeStruct((B, OUT_DIM), F32),
        grid=(1,),
        in_specs=[_full(a.shape) for a in args],
        out_specs=_full((B, OUT_DIM)),
        compiler_params=pltpu.CompilerParams(dimension_semantics=("arbitrary",)),
    )(*args)


# ======================= parameters =======================

def init_params(key):
    keys = iter(jax.random.split(key, 24))

    def nrm(shape, scale=0.1):
        return jax.random.normal(next(keys), shape, F32) * scale

    p = {}
    # backbone stand-in weights
    # TODO(synk): real model uses timm resnet50 (features_only, out_indices=(2,3));
    # it has no Pallas equivalent and is replaced by a deterministic stand-in.
    p["stem1_w"], p["stem1_b"] = nrm((3, C2)), nrm((C2,), 0.01)
    p["stem2_w"], p["stem2_b"] = nrm((C2, C3)), nrm((C3,), 0.01)
    # MultiAtrous: three dilated 3x3 convs + GAP-branch 1x1 conv
    for d in DILATIONS:
        p[f"dil{d}_w"] = nrm((3, 3, C2, HC4))
        p[f"dil{d}_b"] = nrm((HC4,), 0.01)
    p["gapbr_w"], p["gapbr_b"] = nrm((C2, HC4)), nrm((HC4,), 0.01)
    # DolgLocalBranch 1x1 convs + BN2d
    p["c11_1_w"], p["c11_1_b"] = nrm((HC, D)), nrm((D,), 0.01)
    p["c11_2_w"] = nrm((D, D))                               # bias=False
    p["bn2_gamma"], p["bn2_beta"] = jnp.ones((D,), F32), jnp.zeros((D,), F32)
    p["c11_3_w"], p["c11_3_b"] = nrm((D, D)), nrm((D,), 0.01)
    # CGD2 ('SG'): Linear(2*feature_dim -> feature_dim, bias=False)
    p["cgd_w"] = nrm((2 * C3, C3))
    # fc_1 and fc_2
    p["fc1_w"], p["fc1_b"] = nrm((C3, D)), nrm((D,), 0.01)
    p["fc2_w"], p["fc2_b"] = nrm((2 * D, OUT_DIM)), nrm((OUT_DIM,), 0.01)
    return p


# ======================= forward pass =======================

def forward(params, x_nchw):
    x = jnp.transpose(x_nchw, (0, 2, 3, 1)).astype(F32)      # NCHW -> NHWC

    # ---- backbone stand-in: stride-8 / stride-16 feature maps ----
    # TODO(synk): timm resnet50 backbone not translatable to Pallas; plain-JAX
    # avg-pool + 1x1-projection stem kept outside Pallas (K=3 matmul not worth MXU).
    def avgpool(z, f):
        b, h, w, c = z.shape
        return z.reshape(b, h // f, f, w // f, f, c).mean(axis=(2, 4))

    z8 = avgpool(x, 8)                                       # [B, H8, W8, 3]
    feat8 = jax.nn.relu(jnp.einsum("bhwc,cd->bhwd", z8, params["stem1_w"])
                        + params["stem1_b"])                 # [B, H8, W8, C2]
    z16 = avgpool(feat8, 2)
    feat16 = jax.nn.relu(jnp.einsum("bhwc,cd->bhwd", z16, params["stem2_w"])
                         + params["stem2_b"])                # [B, H16, W16, C3]

    # ---- everything after the backbone: one fused Pallas kernel ----
    return cgdolg_head(feat8, feat16, params)


# ======================= main =======================

if __name__ == "__main__":
    key = jax.random.PRNGKey(0)
    kx, kp = jax.random.split(key)
    x = jax.random.normal(kx, (B, 3, IMG, IMG), F32)          # NCHW, like PyTorch
    params = init_params(kp)

    feat = jax.jit(forward)(params, x)
    jax.block_until_ready(feat)

    assert feat.shape == (B, OUT_DIM)
    assert bool(jnp.all(jnp.isfinite(feat)))
    print("KERNEL_OK")
</pallas_src>

<mosaic_0001>
module attributes {stable_mosaic.version = 11 : i64} {
  func.func @_cgdolg_kernel(%arg0: i32, %arg1: memref<128x864xbf16, #tpu.memory_space<vmem>>, %arg2: memref<2x32xf32, #tpu.memory_space<vmem>>, %arg3: memref<2x4x4x64xf32, #tpu.memory_space<vmem>>, %arg4: memref<864x24xbf16, #tpu.memory_space<vmem>>, %arg5: memref<1x24xf32, #tpu.memory_space<vmem>>, %arg6: memref<32x8xbf16, #tpu.memory_space<vmem>>, %arg7: memref<1x8xf32, #tpu.memory_space<vmem>>, %arg8: memref<24x64xbf16, #tpu.memory_space<vmem>>, %arg9: memref<8x64xbf16, #tpu.memory_space<vmem>>, %arg10: memref<1x64xf32, #tpu.memory_space<vmem>>, %arg11: memref<64x64xbf16, #tpu.memory_space<vmem>>, %arg12: memref<1x64xf32, #tpu.memory_space<vmem>>, %arg13: memref<1x64xf32, #tpu.memory_space<vmem>>, %arg14: memref<64x64xbf16, #tpu.memory_space<vmem>>, %arg15: memref<1x64xf32, #tpu.memory_space<vmem>>, %arg16: memref<128x64xbf16, #tpu.memory_space<vmem>>, %arg17: memref<64x64xbf16, #tpu.memory_space<vmem>>, %arg18: memref<1x64xf32, #tpu.memory_space<vmem>>, %arg19: memref<128x32xbf16, #tpu.memory_space<vmem>>, %arg20: memref<1x32xf32, #tpu.memory_space<vmem>>, %arg21: memref<2x32xf32, #tpu.memory_space<vmem>>) attributes {dimension_semantics = [#tpu.dimension_semantics<arbitrary>], iteration_bounds = array<i64: 1>, scalar_prefetch = 0 : i64, scratch_operands = 0 : i64, tpu.core_type = #tpu.core_type<tc>, window_params = [{pipeline_mode = #tpu.pipeline_mode<synchronous>, transform_indices = @transform_0, window_bounds = array<i64: 128, 864>}, {pipeline_mode = #tpu.pipeline_mode<synchronous>, transform_indices = @transform_1, window_bounds = array<i64: 2, 32>}, {pipeline_mode = #tpu.pipeline_mode<synchronous>, transform_indices = @transform_2, window_bounds = array<i64: 2, 4, 4, 64>}, {pipeline_mode = #tpu.pipeline_mode<synchronous>, transform_indices = @transform_3, window_bounds = array<i64: 864, 24>}, {pipeline_mode = #tpu.pipeline_mode<synchronous>, transform_indices = @transform_4, window_bounds = array<i64: 1, 24>}, {pipeline_mode = #tpu.pipeline_mode<synchronous>, transform_indices = @transform_5, window_bounds = array<i64: 32, 8>}, {pipeline_mode = #tpu.pipeline_mode<synchronous>, transform_indices = @transform_6, window_bounds = array<i64: 1, 8>}, {pipeline_mode = #tpu.pipeline_mode<synchronous>, transform_indices = @transform_7, window_bounds = array<i64: 24, 64>}, {pipeline_mode = #tpu.pipeline_mode<synchronous>, transform_indices = @transform_8, window_bounds = array<i64: 8, 64>}, {pipeline_mode = #tpu.pipeline_mode<synchronous>, transform_indices = @transform_9, window_bounds = array<i64: 1, 64>}, {pipeline_mode = #tpu.pipeline_mode<synchronous>, transform_indices = @transform_10, window_bounds = array<i64: 64, 64>}, {pipeline_mode = #tpu.pipeline_mode<synchronous>, transform_indices = @transform_11, window_bounds = array<i64: 1, 64>}, {pipeline_mode = #tpu.pipeline_mode<synchronous>, transform_indices = @transform_12, window_bounds = array<i64: 1, 64>}, {pipeline_mode = #tpu.pipeline_mode<synchronous>, transform_indices = @transform_13, window_bounds = array<i64: 64, 64>}, {pipeline_mode = #tpu.pipeline_mode<synchronous>, transform_indices = @transform_14, window_bounds = array<i64: 1, 64>}, {pipeline_mode = #tpu.pipeline_mode<synchronous>, transform_indices = @transform_15, window_bounds = array<i64: 128, 64>}, {pipeline_mode = #tpu.pipeline_mode<synchronous>, transform_indices = @transform_16, window_bounds = array<i64: 64, 64>}, {pipeline_mode = #tpu.pipeline_mode<synchronous>, transform_indices = @transform_17, window_bounds = array<i64: 1, 64>}, {pipeline_mode = #tpu.pipeline_mode<synchronous>, transform_indices = @transform_18, window_bounds = array<i64: 128, 32>}, {pipeline_mode = #tpu.pipeline_mode<synchronous>, transform_indices = @transform_19, window_bounds = array<i64: 1, 32>}, {pipeline_mode = #tpu.pipeline_mode<synchronous>, transform_indices = @transform_20, window_bounds = array<i64: 2, 32>}]} {
    %c0 = arith.constant 0 : index
    %c0_0 = arith.constant 0 : index
    %0 = vector.load %arg1[%c0, %c0_0] : memref<128x864xbf16, #tpu.memory_space<vmem>>, vector<128x864xbf16>
    %c0_1 = arith.constant 0 : index
    %c0_2 = arith.constant 0 : index
    %1 = vector.load %arg4[%c0_1, %c0_2] : memref<864x24xbf16, #tpu.memory_space<vmem>>, vector<864x24xbf16>
    %cst = arith.constant dense<0.000000e+00> : vector<128x24xf32>
    %2 = tpu.matmul %0, %1, %cst {dimension_numbers = #tpu.dot_dimension_numbers<[1], [0], [0], [1], [0, 0, 1, 1], [], []>} : vector<128x864xbf16>, vector<864x24xbf16>, vector<128x24xf32> -> vector<128x24xf32>
    %c0_3 = arith.constant 0 : index
    %c0_4 = arith.constant 0 : index
    %3 = vector.load %arg5[%c0_3, %c0_4] : memref<1x24xf32, #tpu.memory_space<vmem>>, vector<1x24xf32>
    %4 = vector.broadcast %3 : vector<1x24xf32> to vector<128x24xf32>
    %5 = arith.addf %2, %4 : vector<128x24xf32>
    %c0_5 = arith.constant 0 : index
    %c0_6 = arith.constant 0 : index
    %6 = vector.load %arg2[%c0_5, %c0_6] : memref<2x32xf32, #tpu.memory_space<vmem>>, vector<2x32xf32>
    %7 = arith.truncf %6 : vector<2x32xf32> to vector<2x32xbf16>
    %c0_7 = arith.constant 0 : index
    %c0_8 = arith.constant 0 : index
    %8 = vector.load %arg6[%c0_7, %c0_8] : memref<32x8xbf16, #tpu.memory_space<vmem>>, vector<32x8xbf16>
    %cst_9 = arith.constant dense<0.000000e+00> : vector<2x8xf32>
    %9 = tpu.matmul %7, %8, %cst_9 {dimension_numbers = #tpu.dot_dimension_numbers<[1], [0], [0], [1], [0, 0, 1, 1], [], []>} : vector<2x32xbf16>, vector<32x8xbf16>, vector<2x8xf32> -> vector<2x8xf32>
    %c0_10 = arith.constant 0 : index
    %c0_11 = arith.constant 0 : index
    %10 = vector.load %arg7[%c0_10, %c0_11] : memref<1x8xf32, #tpu.memory_space<vmem>>, vector<1x8xf32>
    %11 = vector.broadcast %10 : vector<1x8xf32> to vector<2x8xf32>
    %12 = arith.addf %9, %11 : vector<2x8xf32>
    %cst_12 = arith.constant 0.000000e+00 : f32
    %13 = vector.broadcast %cst_12 : f32 to vector<2x8xf32>
    %14 = arith.maximumf %12, %13 : vector<2x8xf32>
    %15 = arith.truncf %5 : vector<128x24xf32> to vector<128x24xbf16>
    %c0_13 = arith.constant 0 : index
    %c0_14 = arith.constant 0 : index
    %16 = vector.load %arg8[%c0_13, %c0_14] : memref<24x64xbf16, #tpu.memory_space<vmem>>, vector<24x64xbf16>
    %cst_15 = arith.constant dense<0.000000e+00> : vector<128x64xf32>
    %17 = tpu.matmul %15, %16, %cst_15 {dimension_numbers = #tpu.dot_dimension_numbers<[1], [0], [0], [1], [0, 0, 1, 1], [], []>} : vector<128x24xbf16>, vector<24x64xbf16>, vector<128x64xf32> -> vector<128x64xf32>
    %18 = arith.truncf %14 : vector<2x8xf32> to vector<2x8xbf16>
    %c0_16 = arith.constant 0 : index
    %c0_17 = arith.constant 0 : index
    %19 = vector.load %arg9[%c0_16, %c0_17] : memref<8x64xbf16, #tpu.memory_space<vmem>>, vector<8x64xbf16>
    %cst_18 = arith.constant dense<0.000000e+00> : vector<2x64xf32>
    %20 = tpu.matmul %18, %19, %cst_18 {dimension_numbers = #tpu.dot_dimension_numbers<[1], [0], [0], [1], [0, 0, 1, 1], [], []>} : vector<2x8xbf16>, vector<8x64xbf16>, vector<2x64xf32> -> vector<2x64xf32>
    %21 = vector.shape_cast %20 : vector<2x64xf32> to vector<2x1x64xf32>
    %22 = vector.shape_cast %21 : vector<2x1x64xf32> to vector<2x1x64xf32>
    %23 = vector.broadcast %22 : vector<2x1x64xf32> to vector<2x64x64xf32>
    %24 = vector.shape_cast %23 : vector<2x64x64xf32> to vector<128x64xf32>
    %25 = arith.addf %17, %24 : vector<128x64xf32>
    %c0_19 = arith.constant 0 : index
    %c0_20 = arith.constant 0 : index
    %26 = vector.load %arg10[%c0_19, %c0_20] : memref<1x64xf32, #tpu.memory_space<vmem>>, vector<1x64xf32>
    %27 = vector.broadcast %26 : vector<1x64xf32> to vector<128x64xf32>
    %28 = arith.addf %25, %27 : vector<128x64xf32>
    %cst_21 = arith.constant 0.000000e+00 : f32
    %29 = vector.broadcast %cst_21 : f32 to vector<128x64xf32>
    %30 = arith.maximumf %28, %29 : vector<128x64xf32>
    %31 = arith.truncf %30 : vector<128x64xf32> to vector<128x64xbf16>
    %c0_22 = arith.constant 0 : index
    %c0_23 = arith.constant 0 : index
    %32 = vector.load %arg11[%c0_22, %c0_23] : memref<64x64xbf16, #tpu.memory_space<vmem>>, vector<64x64xbf16>
    %cst_24 = arith.constant dense<0.000000e+00> : vector<128x64xf32>
    %33 = tpu.matmul %31, %32, %cst_24 {dimension_numbers = #tpu.dot_dimension_numbers<[1], [0], [0], [1], [0, 0, 1, 1], [], []>} : vector<128x64xbf16>, vector<64x64xbf16>, vector<128x64xf32> -> vector<128x64xf32>
    %cst_25 = arith.constant dense<0.000000e+00> : vector<64xf32>
    %34 = vector.multi_reduction <add>, %33, %cst_25 [0] : vector<128x64xf32> to vector<64xf32>
    %35 = vector.shape_cast %34 : vector<64xf32> to vector<1x64xf32>
    %cst_26 = arith.constant 1.280000e+02 : f32
    %36 = vector.broadcast %cst_26 : f32 to vector<1x64xf32>
    %37 = arith.divf %35, %36 : vector<1x64xf32>
    %38 = vector.broadcast %37 : vector<1x64xf32> to vector<128x64xf32>
    %39 = arith.subf %33, %38 : vector<128x64xf32>
    %40 = vector.broadcast %37 : vector<1x64xf32> to vector<128x64xf32>
    %41 = arith.subf %33, %40 : vector<128x64xf32>
    %42 = arith.mulf %39, %41 : vector<128x64xf32>
    %cst_27 = arith.constant dense<0.000000e+00> : vector<64xf32>
    %43 = vector.multi_reduction <add>, %42, %cst_27 [0] : vector<128x64xf32> to vector<64xf32>
    %44 = vector.shape_cast %43 : vector<64xf32> to vector<1x64xf32>
    %cst_28 = arith.constant 1.280000e+02 : f32
    %45 = vector.broadcast %cst_28 : f32 to vector<1x64xf32>
    %46 = arith.divf %44, %45 : vector<1x64xf32>
    %47 = vector.broadcast %37 : vector<1x64xf32> to vector<128x64xf32>
    %48 = arith.subf %33, %47 : vector<128x64xf32>
    %c0_29 = arith.constant 0 : index
    %c0_30 = arith.constant 0 : index
    %49 = vector.load %arg12[%c0_29, %c0_30] : memref<1x64xf32, #tpu.memory_space<vmem>>, vector<1x64xf32>
    %cst_31 = arith.constant 9.99999974E-6 : f32
    %50 = vector.broadcast %cst_31 : f32 to vector<1x64xf32>
    %51 = arith.addf %46, %50 : vector<1x64xf32>
    %52 = math.rsqrt %51 : vector<1x64xf32>
    %53 = arith.mulf %49, %52 : vector<1x64xf32>
    %54 = vector.broadcast %53 : vector<1x64xf32> to vector<128x64xf32>
    %55 = arith.mulf %48, %54 : vector<128x64xf32>
    %c0_32 = arith.constant 0 : index
    %c0_33 = arith.constant 0 : index
    %56 = vector.load %arg13[%c0_32, %c0_33] : memref<1x64xf32, #tpu.memory_space<vmem>>, vector<1x64xf32>
    %57 = vector.broadcast %56 : vector<1x64xf32> to vector<128x64xf32>
    %58 = arith.addf %55, %57 : vector<128x64xf32>
    %cst_34 = arith.constant 0.000000e+00 : f32
    %59 = vector.broadcast %cst_34 : f32 to vector<128x64xf32>
    %60 = arith.maximumf %58, %59 : vector<128x64xf32>
    %61 = arith.truncf %60 : vector<128x64xf32> to vector<128x64xbf16>
    %c0_35 = arith.constant 0 : index
    %c0_36 = arith.constant 0 : index
    %62 = vector.load %arg14[%c0_35, %c0_36] : memref<64x64xbf16, #tpu.memory_space<vmem>>, vector<64x64xbf16>
    %cst_37 = arith.constant dense<0.000000e+00> : vector<128x64xf32>
    %63 = tpu.matmul %61, %62, %cst_37 {dimension_numbers = #tpu.dot_dimension_numbers<[1], [0], [0], [1], [0, 0, 1, 1], [], []>} : vector<128x64xbf16>, vector<64x64xbf16>, vector<128x64xf32> -> vector<128x64xf32>
    %c0_38 = arith.constant 0 : index
    %c0_39 = arith.constant 0 : index
    %64 = vector.load %arg15[%c0_38, %c0_39] : memref<1x64xf32, #tpu.memory_space<vmem>>, vector<1x64xf32>
    %65 = vector.broadcast %64 : vector<1x64xf32> to vector<128x64xf32>
    %66 = arith.addf %63, %65 : vector<128x64xf32>
    %cst_40 = arith.constant 2.000000e+01 : f32
    %67 = vector.broadcast %cst_40 : f32 to vector<128x64xf32>
    %68 = arith.cmpf ogt, %66, %67 : vector<128x64xf32>
    %cst_41 = arith.constant 2.000000e+01 : f32
    %69 = vector.broadcast %cst_41 : f32 to vector<128x64xf32>
    %70 = arith.minimumf %66, %69 : vector<128x64xf32>
    %71 = math.exp %70 : vector<128x64xf32>
    %cst_42 = arith.constant 1.000000e+00 : f32
    %72 = vector.broadcast %cst_42 : f32 to vector<128x64xf32>
    %73 = arith.addf %72, %71 : vector<128x64xf32>
    %74 = math.log %73 : vector<128x64xf32>
    %75 = arith.select %68, %66, %74 : vector<128x64xi1>, vector<128x64xf32>
    %76 = arith.mulf %58, %58 : vector<128x64xf32>
    %cst_43 = arith.constant dense<0.000000e+00> : vector<128xf32>
    %77 = vector.multi_reduction <add>, %76, %cst_43 [1] : vector<128x64xf32> to vector<128xf32>
    %78 = vector.shape_cast %77 : vector<128xf32> to vector<128x1xf32>
    %cst_44 = arith.constant 1.000000e-24 : f32
    %79 = vector.broadcast %cst_44 : f32 to vector<128x1xf32>
    %80 = arith.maximumf %78, %79 : vector<128x1xf32>
    %81 = math.rsqrt %80 : vector<128x1xf32>
    %82 = vector.broadcast %81 : vector<128x1xf32> to vector<128x64xf32>
    %83 = arith.mulf %58, %82 : vector<128x64xf32>
    %84 = arith.mulf %83, %75 : vector<128x64xf32>
    %c0_45 = arith.constant 0 : index
    %c0_46 = arith.constant 0 : index
    %c0_47 = arith.constant 0 : index
    %c0_48 = arith.constant 0 : index
    %85 = vector.load %arg3[%c0_45, %c0_46, %c0_47, %c0_48] : memref<2x4x4x64xf32, #tpu.memory_space<vmem>>, vector<2x4x4x64xf32>
    %86 = vector.shape_cast %85 : vector<2x4x4x64xf32> to vector<2x16x64xf32>
    %cst_49 = arith.constant dense<0.000000e+00> : vector<2x64xf32>
    %87 = vector.multi_reduction <add>, %86, %cst_49 [1] : vector<2x16x64xf32> to vector<2x64xf32>
    %cst_50 = arith.constant 1.600000e+01 : f32
    %88 = vector.broadcast %cst_50 : f32 to vector<2x64xf32>
    %89 = arith.divf %87, %88 : vector<2x64xf32>
    %cst_51 = arith.constant 9.99999997E-7 : f32
    %90 = vector.broadcast %cst_51 : f32 to vector<2x16x64xf32>
    %91 = arith.maximumf %86, %90 : vector<2x16x64xf32>
    %92 = arith.mulf %91, %91 : vector<2x16x64xf32>
    %93 = arith.mulf %92, %91 : vector<2x16x64xf32>
    %cst_52 = arith.constant dense<0.000000e+00> : vector<2x64xf32>
    %94 = vector.multi_reduction <add>, %93, %cst_52 [1] : vector<2x16x64xf32> to vector<2x64xf32>
    %cst_53 = arith.constant 1.600000e+01 : f32
    %95 = vector.broadcast %cst_53 : f32 to vector<2x64xf32>
    %96 = arith.divf %94, %95 : vector<2x64xf32>
    %97 = math.log %96 : vector<2x64xf32>
    %cst_54 = arith.constant 0.333333343 : f32
    %98 = vector.broadcast %cst_54 : f32 to vector<2x64xf32>
    %99 = arith.mulf %97, %98 : vector<2x64xf32>
    %100 = math.exp %99 : vector<2x64xf32>
    %101 = arith.mulf %89, %89 : vector<2x64xf32>
    %cst_55 = arith.constant dense<0.000000e+00> : vector<2xf32>
    %102 = vector.multi_reduction <add>, %101, %cst_55 [1] : vector<2x64xf32> to vector<2xf32>
    %103 = vector.shape_cast %102 : vector<2xf32> to vector<2x1xf32>
    %cst_56 = arith.constant 1.000000e-24 : f32
    %104 = vector.broadcast %cst_56 : f32 to vector<2x1xf32>
    %105 = arith.maximumf %103, %104 : vector<2x1xf32>
    %106 = math.rsqrt %105 : vector<2x1xf32>
    %107 = vector.broadcast %106 : vector<2x1xf32> to vector<2x64xf32>
    %108 = arith.mulf %89, %107 : vector<2x64xf32>
    %109 = arith.mulf %100, %100 : vector<2x64xf32>
    %cst_57 = arith.constant dense<0.000000e+00> : vector<2xf32>
    %110 = vector.multi_reduction <add>, %109, %cst_57 [1] : vector<2x64xf32> to vector<2xf32>
    %111 = vector.shape_cast %110 : vector<2xf32> to vector<2x1xf32>
    %cst_58 = arith.constant 1.000000e-24 : f32
    %112 = vector.broadcast %cst_58 : f32 to vector<2x1xf32>
    %113 = arith.maximumf %111, %112 : vector<2x1xf32>
    %114 = math.rsqrt %113 : vector<2x1xf32>
    %115 = vector.broadcast %114 : vector<2x1xf32> to vector<2x64xf32>
    %116 = arith.mulf %100, %115 : vector<2x64xf32>
    %117 = tpu.concatenate %108, %116 in 1 : vector<2x64xf32>, vector<2x64xf32> -> vector<2x128xf32>
    %118 = arith.truncf %117 : vector<2x128xf32> to vector<2x128xbf16>
    %c0_59 = arith.constant 0 : index
    %c0_60 = arith.constant 0 : index
    %119 = vector.load %arg16[%c0_59, %c0_60] : memref<128x64xbf16, #tpu.memory_space<vmem>>, vector<128x64xbf16>
    %cst_61 = arith.constant dense<0.000000e+00> : vector<2x64xf32>
    %120 = tpu.matmul %118, %119, %cst_61 {dimension_numbers = #tpu.dot_dimension_numbers<[1], [0], [0], [1], [0, 0, 1, 1], [], []>} : vector<2x128xbf16>, vector<128x64xbf16>, vector<2x64xf32> -> vector<2x64xf32>
    %121 = arith.mulf %120, %120 : vector<2x64xf32>
    %cst_62 = arith.constant dense<0.000000e+00> : vector<2xf32>
    %122 = vector.multi_reduction <add>, %121, %cst_62 [1] : vector<2x64xf32> to vector<2xf32>
    %123 = vector.shape_cast %122 : vector<2xf32> to vector<2x1xf32>
    %cst_63 = arith.constant 1.000000e-24 : f32
    %124 = vector.broadcast %cst_63 : f32 to vector<2x1xf32>
    %125 = arith.maximumf %123, %124 : vector<2x1xf32>
    %126 = math.rsqrt %125 : vector<2x1xf32>
    %127 = vector.broadcast %126 : vector<2x1xf32> to vector<2x64xf32>
    %128 = arith.mulf %120, %127 : vector<2x64xf32>
    %129 = arith.truncf %128 : vector<2x64xf32> to vector<2x64xbf16>
    %c0_64 = arith.constant 0 : index
    %c0_65 = arith.constant 0 : index
    %130 = vector.load %arg17[%c0_64, %c0_65] : memref<64x64xbf16, #tpu.memory_space<vmem>>, vector<64x64xbf16>
    %cst_66 = arith.constant dense<0.000000e+00> : vector<2x64xf32>
    %131 = tpu.matmul %129, %130, %cst_66 {dimension_numbers = #tpu.dot_dimension_numbers<[1], [0], [0], [1], [0, 0, 1, 1], [], []>} : vector<2x64xbf16>, vector<64x64xbf16>, vector<2x64xf32> -> vector<2x64xf32>
    %c0_67 = arith.constant 0 : index
    %c0_68 = arith.constant 0 : index
    %132 = vector.load %arg18[%c0_67, %c0_68] : memref<1x64xf32, #tpu.memory_space<vmem>>, vector<1x64xf32>
    %133 = vector.broadcast %132 : vector<1x64xf32> to vector<2x64xf32>
    %134 = arith.addf %131, %133 : vector<2x64xf32>
    %135 = vector.shape_cast %84 : vector<128x64xf32> to vector<2x64x64xf32>
    %136 = arith.mulf %134, %134 : vector<2x64xf32>
    %cst_69 = arith.constant dense<0.000000e+00> : vector<2xf32>
    %137 = vector.multi_reduction <add>, %136, %cst_69 [1] : vector<2x64xf32> to vector<2xf32>
    %138 = vector.shape_cast %137 : vector<2xf32> to vector<2x1xf32>
    %139 = tpu.reciprocal %138 {approx = true} : vector<2x1xf32> -> vector<2x1xf32>
    %140 = vector.shape_cast %134 : vector<2x64xf32> to vector<2x1x64xf32>
    %141 = vector.broadcast %140 : vector<2x1x64xf32> to vector<2x64x64xf32>
    %142 = arith.mulf %135, %141 : vector<2x64x64xf32>
    %cst_70 = arith.constant dense<0.000000e+00> : vector<2x64xf32>
    %143 = vector.multi_reduction <add>, %142, %cst_70 [2] : vector<2x64x64xf32> to vector<2x64xf32>
    %144 = vector.shape_cast %143 : vector<2x64xf32> to vector<2x64x1xf32>
    %145 = vector.shape_cast %139 : vector<2x1xf32> to vector<2x1x1xf32>
    %146 = vector.broadcast %145 : vector<2x1x1xf32> to vector<2x64x1xf32>
    %147 = arith.mulf %144, %146 : vector<2x64x1xf32>
    %148 = vector.shape_cast %134 : vector<2x64xf32> to vector<2x1x64xf32>
    %149 = vector.broadcast %147 : vector<2x64x1xf32> to vector<2x64x64xf32>
    %150 = vector.broadcast %148 : vector<2x1x64xf32> to vector<2x64x64xf32>
    %151 = arith.mulf %149, %150 : vector<2x64x64xf32>
    %152 = arith.subf %135, %151 : vector<2x64x64xf32>
    %cst_71 = arith.constant dense<0.000000e+00> : vector<2x64xf32>
    %153 = vector.multi_reduction <add>, %152, %cst_71 [1] : vector<2x64x64xf32> to vector<2x64xf32>
    %cst_72 = arith.constant 6.400000e+01 : f32
    %154 = vector.broadcast %cst_72 : f32 to vector<2x64xf32>
    %155 = arith.divf %153, %154 : vector<2x64xf32>
    %156 = tpu.concatenate %134, %155 in 1 : vector<2x64xf32>, vector<2x64xf32> -> vector<2x128xf32>
    %157 = arith.truncf %156 : vector<2x128xf32> to vector<2x128xbf16>
    %c0_73 = arith.constant 0 : index
    %c0_74 = arith.constant 0 : index
    %158 = vector.load %arg19[%c0_73, %c0_74] : memref<128x32xbf16, #tpu.memory_space<vmem>>, vector<128x32xbf16>
    %cst_75 = arith.constant dense<0.000000e+00> : vector<2x32xf32>
    %159 = tpu.matmul %157, %158, %cst_75 {dimension_numbers = #tpu.dot_dimension_numbers<[1], [0], [0], [1], [0, 0, 1, 1], [], []>} : vector<2x128xbf16>, vector<128x32xbf16>, vector<2x32xf32> -> vector<2x32xf32>
    %c0_76 = arith.constant 0 : index
    %c0_77 = arith.constant 0 : index
    %160 = vector.load %arg20[%c0_76, %c0_77] : memref<1x32xf32, #tpu.memory_space<vmem>>, vector<1x32xf32>
    %161 = vector.broadcast %160 : vector<1x32xf32> to vector<2x32xf32>
    %162 = arith.addf %159, %161 : vector<2x32xf32>
    %c0_78 = arith.constant 0 : index
    %c0_79 = arith.constant 0 : index
    %163 = vector.load %arg21[%c0_78, %c0_79] : memref<2x32xf32, #tpu.memory_space<vmem>>, vector<2x32xf32>
    tpu.vector_store %arg21[%c0_78, %c0_79], %162 {strides = array<i32>} : memref<2x32xf32, #tpu.memory_space<vmem>>, vector<2x32xf32>,
    return
  }
  func.func @transform_0(%arg0: i32) -> (i32, i32) {
    %c0_i32 = arith.constant 0 : i32
    %c0_i32_0 = arith.constant 0 : i32
    %c0_i32_1 = arith.constant 0 : i32
    return %c0_i32, %c0_i32_0 : i32, i32
  }
  func.func @transform_1(%arg0: i32) -> (i32, i32) {
    %c0_i32 = arith.constant 0 : i32
    %c0_i32_0 = arith.constant 0 : i32
    %c0_i32_1 = arith.constant 0 : i32
    return %c0_i32, %c0_i32_0 : i32, i32
  }
  func.func @transform_2(%arg0: i32) -> (i32, i32, i32, i32) {
    %c0_i32 = arith.constant 0 : i32
    %c0_i32_0 = arith.constant 0 : i32
    %c0_i32_1 = arith.constant 0 : i32
    %c0_i32_2 = arith.constant 0 : i32
    %c0_i32_3 = arith.constant 0 : i32
    return %c0_i32, %c0_i32_0, %c0_i32_1, %c0_i32_2 : i32, i32, i32, i32
  }
  func.func @transform_3(%arg0: i32) -> (i32, i32) {
    %c0_i32 = arith.constant 0 : i32
    %c0_i32_0 = arith.constant 0 : i32
    %c0_i32_1 = arith.constant 0 : i32
    return %c0_i32, %c0_i32_0 : i32, i32
  }
  func.func @transform_4(%arg0: i32) -> (i32, i32) {
    %c0_i32 = arith.constant 0 : i32
    %c0_i32_0 = arith.constant 0 : i32
    %c0_i32_1 = arith.constant 0 : i32
    return %c0_i32, %c0_i32_0 : i32, i32
  }
  func.func @transform_5(%arg0: i32) -> (i32, i32) {
    %c0_i32 = arith.constant 0 : i32
    %c0_i32_0 = arith.constant 0 : i32
    %c0_i32_1 = arith.constant 0 : i32
    return %c0_i32, %c0_i32_0 : i32, i32
  }
  func.func @transform_6(%arg0: i32) -> (i32, i32) {
    %c0_i32 = arith.constant 0 : i32
    %c0_i32_0 = arith.constant 0 : i32
    %c0_i32_1 = arith.constant 0 : i32
    return %c0_i32, %c0_i32_0 : i32, i32
  }
  func.func @transform_7(%arg0: i32) -> (i32, i32) {
    %c0_i32 = arith.constant 0 : i32
    %c0_i32_0 = arith.constant 0 : i32
    %c0_i32_1 = arith.constant 0 : i32
    return %c0_i32, %c0_i32_0 : i32, i32
  }
  func.func @transform_8(%arg0: i32) -> (i32, i32) {
    %c0_i32 = arith.constant 0 : i32
    %c0_i32_0 = arith.constant 0 : i32
    %c0_i32_1 = arith.constant 0 : i32
    return %c0_i32, %c0_i32_0 : i32, i32
  }
  func.func @transform_9(%arg0: i32) -> (i32, i32) {
    %c0_i32 = arith.constant 0 : i32
    %c0_i32_0 = arith.constant 0 : i32
    %c0_i32_1 = arith.constant 0 : i32
    return %c0_i32, %c0_i32_0 : i32, i32
  }
  func.func @transform_10(%arg0: i32) -> (i32, i32) {
    %c0_i32 = arith.constant 0 : i32
    %c0_i32_0 = arith.constant 0 : i32
    %c0_i32_1 = arith.constant 0 : i32
    return %c0_i32, %c0_i32_0 : i32, i32
  }
  func.func @transform_11(%arg0: i32) -> (i32, i32) {
    %c0_i32 = arith.constant 0 : i32
    %c0_i32_0 = arith.constant 0 : i32
    %c0_i32_1 = arith.constant 0 : i32
    return %c0_i32, %c0_i32_0 : i32, i32
  }
  func.func @transform_12(%arg0: i32) -> (i32, i32) {
    %c0_i32 = arith.constant 0 : i32
    %c0_i32_0 = arith.constant 0 : i32
    %c0_i32_1 = arith.constant 0 : i32
    return %c0_i32, %c0_i32_0 : i32, i32
  }
  func.func @transform_13(%arg0: i32) -> (i32, i32) {
    %c0_i32 = arith.constant 0 : i32
    %c0_i32_0 = arith.constant 0 : i32
    %c0_i32_1 = arith.constant 0 : i32
    return %c0_i32, %c0_i32_0 : i32, i32
  }
  func.func @transform_14(%arg0: i32) -> (i32, i32) {
    %c0_i32 = arith.constant 0 : i32
    %c0_i32_0 = arith.constant 0 : i32
    %c0_i32_1 = arith.constant 0 : i32
    return %c0_i32, %c0_i32_0 : i32, i32
  }
  func.func @transform_15(%arg0: i32) -> (i32, i32) {
    %c0_i32 = arith.constant 0 : i32
    %c0_i32_0 = arith.constant 0 : i32
    %c0_i32_1 = arith.constant 0 : i32
    return %c0_i32, %c0_i32_0 : i32, i32
  }
  func.func @transform_16(%arg0: i32) -> (i32, i32) {
    %c0_i32 = arith.constant 0 : i32
    %c0_i32_0 = arith.constant 0 : i32
    %c0_i32_1 = arith.constant 0 : i32
    return %c0_i32, %c0_i32_0 : i32, i32
  }
  func.func @transform_17(%arg0: i32) -> (i32, i32) {
    %c0_i32 = arith.constant 0 : i32
    %c0_i32_0 = arith.constant 0 : i32
    %c0_i32_1 = arith.constant 0 : i32
    return %c0_i32, %c0_i32_0 : i32, i32
  }
  func.func @transform_18(%arg0: i32) -> (i32, i32) {
    %c0_i32 = arith.constant 0 : i32
    %c0_i32_0 = arith.constant 0 : i32
    %c0_i32_1 = arith.constant 0 : i32
    return %c0_i32, %c0_i32_0 : i32, i32
  }
  func.func @transform_19(%arg0: i32) -> (i32, i32) {
    %c0_i32 = arith.constant 0 : i32
    %c0_i32_0 = arith.constant 0 : i32
    %c0_i32_1 = arith.constant 0 : i32
    return %c0_i32, %c0_i32_0 : i32, i32
  }
  func.func @transform_20(%arg0: i32) -> (i32, i32) {
    %c0_i32 = arith.constant 0 : i32
    %c0_i32_0 = arith.constant 0 : i32
    %c0_i32_1 = arith.constant 0 : i32
    return %c0_i32, %c0_i32_0 : i32, i32
  }
}

</mosaic_0001>

<bundles_post_ra>
// kernel: forward.1
= control target key start
LH: loop header
LB: loop body
LE: loop exit
PB: predicated region body
PF: predicated region fallthrough
CT: control target
= control target key end

     0   :  { %s5510_s0 = inlined_call_operand.vmem [shape: bf16[128,864], index: 0, kind: input, shape index: {}]   ;;  %s5511_s1 = inlined_call_operand.vmem [shape: f32[2,32], index: 1, kind: input, shape index: {}]   ;;  %s5512_s2 = inlined_call_operand.vmem [shape: f32[2,4,4,64], index: 2, kind: input, shape index: {}]   ;;  %s5513_s3 = inlined_call_operand.vmem [shape: bf16[864,24], index: 3, kind: input, shape index: {}]   ;;  %s5514_s4 = inlined_call_operand.vmem [shape: f32[1,24], index: 4, kind: input, shape index: {}]   ;;  %s5515_s5 = inlined_call_operand.vmem [shape: bf16[32,8], index: 5, kind: input, shape index: {}]   ;;  %s5516_s6 = inlined_call_operand.vmem [shape: f32[1,8], index: 6, kind: input, shape index: {}]   ;;  %s5517_s7 = inlined_call_operand.vmem [shape: bf16[24,64], index: 7, kind: input, shape index: {}]   ;;  %s5518_s8 = inlined_call_operand.vmem [shape: bf16[8,64], index: 8, kind: input, shape index: {}]   ;;  %s5519_s9 = inlined_call_operand.vmem [shape: f32[1,64], index: 9, kind: input, shape index: {}]   ;;  %s5520_s10 = inlined_call_operand.vmem [shape: bf16[64,64], index: 10, kind: input, shape index: {}]   ;;  %s5521_s11 = inlined_call_operand.vmem [shape: f32[1,64], index: 11, kind: input, shape index: {}]   ;;  %s5522_s12 = inlined_call_operand.vmem [shape: f32[1,64], index: 12, kind: input, shape index: {}]   ;;  %s5523_s13 = inlined_call_operand.vmem [shape: bf16[64,64], index: 13, kind: input, shape index: {}]   ;;  %s5524_s14 = inlined_call_operand.vmem [shape: f32[1,64], index: 14, kind: input, shape index: {}]   ;;  %s5525_s15 = inlined_call_operand.vmem [shape: bf16[128,64], index: 15, kind: input, shape index: {}]   ;;  %s5526_s16 = inlined_call_operand.vmem [shape: bf16[64,64], index: 16, kind: input, shape index: {}]   ;;  %s5527_s17 = inlined_call_operand.vmem [shape: f32[1,64], index: 17, kind: input, shape index: {}]   ;;  %s5528_s18 = inlined_call_operand.vmem [shape: bf16[128,32], index: 18, kind: input, shape index: {}]   ;;  %s5529_s19 = inlined_call_operand.vmem [shape: f32[1,32], index: 19, kind: input, shape index: {}]   ;;  %s5530_s20 = inlined_call_operand.hbm [shape: f32[2,32], index: 20, kind: output, shape index: {}]  }
   0x1   :  { %5539 = sst [smem:[#allocation8_spill]] %s5510_s0 }
   0x2   :  { %5540 = sst [smem:[#allocation9_spill]] %s5511_s1 }
   0x3   :  { %5541 = sst [smem:[#allocation10_spill]] %s5512_s2 }
   0x4   :  { %5542 = sst [smem:[#allocation11_spill]] %s5513_s3 }
   0x5   :  { %5543 = sst [smem:[#allocation12_spill]] %s5514_s4 }
   0x6   :  { %s5544_s23 = sld [smem:[#allocation11_spill]]  ;;  %vm850_vm0 = vcmask 785408   ;;  %vm1640_vm1 = vcmask 523264  }
   0x7   :  { %s5545_s29 = sld [smem:[#allocation8_spill]] }
   0x8   :  { %s5546_s28 = sld [smem:[#allocation10_spill]] }
   0xc   :  { %v3680_v0 = vld [vmem:[%s5544_s23 + $0x78] sm:$0xff]   ;;  %v3684_v4 = vld [vmem:[%s5544_s23 + $0x70] sm:$0xff]   ;;  %v3688_v8 = vld [vmem:[%s5544_s23 + $0x68] sm:$0xff]  }
   0xd   :  { %v3681_v1 = vld [vmem:[%s5544_s23 + $0xf8] sm:$0xff]   ;;  %3244 = vmatprep.subr.bf16.mxu0 %v3680_v0  ;;  %v3685_v5 = vld [vmem:[%s5544_s23 + $0xf0] sm:$0xff]   ;;  %v3689_v9 = vld [vmem:[%s5544_s23 + $0xe8] sm:$0xff]  }
   0xe   :  { %v3682_v2 = vld [vmem:[%s5544_s23 + $0x38] sm:$0xff]   ;;  %3308 = vmatprep.subr.bf16.mxu1 %v3681_v1  ;;  %v3686_v6 = vld [vmem:[%s5544_s23 + $0x30] sm:$0xff]   ;;  %v3690_v10 = vld [vmem:[%s5544_s23 + $0x28] sm:$0xff]  }
   0xf   :  { %v3683_v3 = vld [vmem:[%s5544_s23 + $0xb8] sm:$0xff]   ;;  %3245 = vmatpush3.bf16.msra.mxu0 %v3682_v2  ;;  %v3687_v7 = vld [vmem:[%s5544_s23 + $0xb0] sm:$0xff]   ;;  %v3691_v11 = vld [vmem:[%s5544_s23 + $0xa8] sm:$0xff]  }
  0x10   :  { %3309 = vmatpush3.bf16.msra.mxu1 %v3683_v3  ;;  %3246 = vmatprep.subr.bf16.mxu0 %v3684_v4  ;;  %v3692_v12 = vld [vmem:[%s5544_s23 + $0x60] sm:$0xff]   ;;  %v3696_v16 = vld [vmem:[%s5544_s23 + $0x58] sm:$0xff]   ;;  %v3700_v20 = vld [vmem:[%s5544_s23 + $0x50] sm:$0xff]  }
  0x11   :  { %3310 = vmatprep.subr.bf16.mxu1 %v3685_v5  ;;  %v3693_v13 = vld [vmem:[%s5544_s23 + $0xe0] sm:$0xff]   ;;  %v3697_v17 = vld [vmem:[%s5544_s23 + $0xd8] sm:$0xff]   ;;  %v3701_v21 = vld [vmem:[%s5544_s23 + $0xd0] sm:$0xff]  }
  0x12   :  { %v3694_v14 = vld [vmem:[%s5544_s23 + $0x20] sm:$0xff]   ;;  %v3698_v18 = vld [vmem:[%s5544_s23 + $0x18] sm:$0xff]   ;;  %v3702_v22 = vld [vmem:[%s5544_s23 + $0x10] sm:$0xff]  }
  0x13   :  { %3247 = vmatpush3.bf16.msra.mxu0 %v3686_v6  ;;  %v3695_v15 = vld [vmem:[%s5544_s23 + $0xa0] sm:$0xff]   ;;  %v3699_v19 = vld [vmem:[%s5544_s23 + $0x98] sm:$0xff]   ;;  %v3703_v23 = vld [vmem:[%s5544_s23 + $0x90] sm:$0xff]  }
  0x14   :  { %3311 = vmatpush3.bf16.msra.mxu1 %v3687_v7  ;;  %3248 = vmatprep.subr.bf16.mxu0 %v3688_v8  ;;  %v3704_v24 = vld [vmem:[%s5544_s23 + $0x48] sm:$0xff]   ;;  %v3708_v28 = vld [vmem:[%s5544_s23 + $0x40] sm:$0xff]   ;;  %v3718_v36 = vld [vmem:[%s5544_s23 + $0x178] sm:$0xff]  }
  0x15   :  { %3312 = vmatprep.subr.bf16.mxu1 %v3689_v9  ;;  %v3705_v25 = vld [vmem:[%s5544_s23 + $0xc8] sm:$0xff]   ;;  %v3709_v29 = vld [vmem:[%s5544_s23 + $0xc0] sm:$0xff]   ;;  %v3720_v38 = vld [vmem:[%s5544_s23 + $0x138] sm:$0xff]  }
  0x16   :  { %v3706_v26 = vld [vmem:[%s5544_s23 + $0x8] sm:$0xff]   ;;  %v3710_v30 = vld [vmem:[%s5544_s23] sm:$0xff]   ;;  %v3721_v39 = vld [vmem:[%s5545_s29 + $0x3c] ss:$28 sps:$4 sm:$0xff]  }
  0x17   :  { %3249 = vmatpush3.bf16.msra.mxu0 %v3690_v10  ;;  %v3707_v27 = vld [vmem:[%s5544_s23 + $0x88] sm:$0xff]   ;;  %v3711_v31 = vld [vmem:[%s5544_s23 + $0x80] sm:$0xff]   ;;  %v3725_v41 = vld [vmem:[%s5545_s29 + $0x38] ss:$28 sps:$4 sm:$0xff]  }
  0x18   :  { %3313 = vmatpush3.bf16.msra.mxu1 %v3691_v11  ;;  %3250 = vmatprep.subr.bf16.mxu0 %v3692_v12  ;;  %v3712_v32 = vld [vmem:[%s5545_s29] ss:$28 sps:$4 sm:$0xff]   ;;  %v3715_v34 = vld [vmem:[%s5545_s29 + $0x8] ss:$28 sps:$4 sm:$0xff]   ;;  %v3727_v43 = vld [vmem:[%s5544_s23 + $0x170] sm:$0xff]  }
  0x19   :  { %3314 = vmatprep.subr.bf16.mxu1 %v3693_v13  ;;  %v3714_v33 = vld [vmem:[%s5545_s29 + $0x4] ss:$28 sps:$4 sm:$0xff]   ;;  %v3717_v35 = vld [vmem:[%s5545_s29 + $0xc] ss:$28 sps:$4 sm:$0xff]   ;;  %v3728_v44 = vld [vmem:[%s5544_s23 + $0x130] sm:$0xff]  }
  0x1a   :  { %907 = vmatprep.mubr.bf16.mxu0 %v3714_v33  ;;  %1004 = vmatprep.mubr.bf16.mxu1 %v3717_v35  ;;  %v3719_v37 = vld [vmem:[%s5544_s23 + $0x1a8] sm:$0xff]   ;;  %v3723_v40 = vld [vmem:[%s5545_s29 + $0x44] ss:$28 sps:$4 sm:$0xff]   ;;  %v3730_v46 = vld [vmem:[%s5545_s29 + $0x74] ss:$28 sps:$4 sm:$0xff]  }
  0x1b   :  { %3251 = vmatpush3.bf16.msra.mxu0 %v3694_v14  ;;  %v3726_v42 = vld [vmem:[%s5545_s29 + $0x40] ss:$28 sps:$4 sm:$0xff]   ;;  %v3734_v48 = vld [vmem:[%s5545_s29 + $0x70] ss:$28 sps:$4 sm:$0xff]   ;;  %v3735_v50 = vld [vmem:[%s5545_s29 + $0x78] ss:$28 sps:$4 sm:$0xff]  }
  0x1c   :  { %3315 = vmatpush3.bf16.msra.mxu1 %v3695_v15  ;;  %3252 = vmatprep.subr.bf16.mxu0 %v3696_v16  ;;  %v3729_v45 = vld [vmem:[%s5544_s23 + $0x1a0] sm:$0xff]   ;;  %v3732_v47 = vld [vmem:[%s5545_s29 + $0x7c] ss:$28 sps:$4 sm:$0xff]   ;;  %v3736_v49 = vld [vmem:[%s5544_s23 + $0x168] sm:$0xff]   ;;  %v5534_v15 = vmov 0.0  }
  0x1d   :  { %3316 = vmatprep.subr.bf16.mxu1 %v3697_v17  ;;  %v3737_v51 = vld [vmem:[%s5544_s23 + $0x128] sm:$0xff]   ;;  %v3738_v52 = vld [vmem:[%s5544_s23 + $0x198] sm:$0xff]   ;;  %v3741_v54 = vld [vmem:[%s5545_s29 + $0xb4] ss:$28 sps:$4 sm:$0xff]  }
  0x1e   :  { %v3739_v53 = vld [vmem:[%s5545_s29 + $0xac] ss:$28 sps:$4 sm:$0xff]   ;;  %v3745_v55 = vld [vmem:[%s5544_s23 + $0x160] sm:$0xff]   ;;  %v3753_v61 = vld [vmem:[%s5544_s23 + $0x158] sm:$0xff]  }
  0x1f   :  { %3253 = vmatpush3.bf16.msra.mxu0 %v3698_v18  ;;  %v3746_v56 = vld [vmem:[%s5544_s23 + $0x120] sm:$0xff]   ;;  %v3744_v58 = vld [vmem:[%s5545_s29 + $0xb0] ss:$28 sps:$4 sm:$0xff]   ;;  %v3755_v63 = vld [vmem:[%s5544_s23 + $0x118] sm:$0xff]  }
  0x20   :  { %3317 = vmatpush3.bf16.msra.mxu1 %v3699_v19  ;;  %3254 = vmatprep.subr.bf16.mxu0 %v3700_v20  ;;  %v3743_v57 = vld [vmem:[%s5545_s29 + $0xa8] ss:$28 sps:$4 sm:$0xff]   ;;  %v3754_v62 = vld [vmem:[%s5544_s23 + $0x190] sm:$0xff]   ;;  %v3751_v0 = vld [vmem:[%s5545_s29 + $0xe0] ss:$28 sps:$4 sm:$0xff]  }
  0x21   :  { %3318 = vmatprep.subr.bf16.mxu1 %v3701_v21  ;;  %v3747_v59 = vld [vmem:[%s5545_s29 + $0xe4] ss:$28 sps:$4 sm:$0xff]   ;;  %v3749_v60 = vld [vmem:[%s5545_s29 + $0xec] ss:$28 sps:$4 sm:$0xff]   ;;  %v3762_v1 = vld [vmem:[%s5544_s23 + $0x150] sm:$0xff]  }
  0x22   :  { %v3752_v2 = vld [vmem:[%s5545_s29 + $0xe8] ss:$28 sps:$4 sm:$0xff]   ;;  %v3763_v3 = vld [vmem:[%s5544_s23 + $0x110] sm:$0xff]   ;;  %v3756_v5 = vld [vmem:[%s5545_s29 + $0x11c] ss:$28 sps:$4 sm:$0xff]  }
  0x23   :  { %3255 = vmatpush3.bf16.msra.mxu0 %v3702_v22  ;;  %v3764_v4 = vld [vmem:[%s5544_s23 + $0x188] sm:$0xff]   ;;  %v3758_v6 = vld [vmem:[%s5545_s29 + $0x124] ss:$28 sps:$4 sm:$0xff]   ;;  %v3760_v10 = vld [vmem:[%s5545_s29 + $0x118] ss:$28 sps:$4 sm:$0xff]  }
  0x24   :  { %3319 = vmatpush3.bf16.msra.mxu1 %v3703_v23  ;;  %3256 = vmatprep.subr.bf16.mxu0 %v3704_v24  ;;  %v3771_v7 = vld [vmem:[%s5544_s23 + $0x148] sm:$0xff]   ;;  %v3773_v9 = vld [vmem:[%s5544_s23 + $0x180] sm:$0xff]   ;;  %v3765_v12 = vld [vmem:[%s5545_s29 + $0x154] ss:$28 sps:$4 sm:$0xff]  }
  0x25   :  { %3320 = vmatprep.subr.bf16.mxu1 %v3705_v25  ;;  %v3772_v8 = vld [vmem:[%s5544_s23 + $0x108] sm:$0xff]   ;;  %v3761_v11 = vld [vmem:[%s5545_s29 + $0x120] ss:$28 sps:$4 sm:$0xff]   ;;  %v3770_v18 = vld [vmem:[%s5545_s29 + $0x158] ss:$28 sps:$4 sm:$0xff]  }
  0x26   :  { %v3767_v13 = vld [vmem:[%s5545_s29 + $0x15c] ss:$28 sps:$4 sm:$0xff]   ;;  %v3780_v14 = vld [vmem:[%s5544_s23 + $0x140] sm:$0xff]   ;;  %v3769_v17 = vld [vmem:[%s5545_s29 + $0x150] ss:$28 sps:$4 sm:$0xff]  }
  0x27   :  { %3257 = vmatpush3.bf16.msra.mxu0 %v3706_v26  ;;  %v3781_v16 = vld [vmem:[%s5544_s23 + $0x100] sm:$0xff]   ;;  %v3774_v19 = vld [vmem:[%s5545_s29 + $0x18c] ss:$28 sps:$4 sm:$0xff]   ;;  %v3776_v20 = vld [vmem:[%s5545_s29 + $0x194] ss:$28 sps:$4 sm:$0xff]  }
  0x28   :  { %3321 = vmatpush3.bf16.msra.mxu1 %v3707_v27  ;;  %3258 = vmatprep.subr.bf16.mxu0 %v3708_v28  ;;  %v3778_v21 = vld [vmem:[%s5545_s29 + $0x188] ss:$28 sps:$4 sm:$0xff]   ;;  %v3779_v22 = vld [vmem:[%s5545_s29 + $0x190] ss:$28 sps:$4 sm:$0xff]   ;;  %v3785_v24 = vld [vmem:[%s5545_s29 + $0x18] ss:$28 sps:$4 sm:$0xff]  }
  0x29   :  { %3322 = vmatprep.subr.bf16.mxu1 %v3709_v29  ;;  %v3784_v23 = vld [vmem:[%s5545_s29 + $0x14] ss:$28 sps:$4 sm:$0xff]   ;;  %v3788_v27 = vld [vmem:[%s5545_s29 + $0x4c] ss:$28 sps:$4 sm:$0xff]   ;;  %v3793_v33 = vld [vmem:[%s5545_s29 + $0x84] ss:$28 sps:$4 sm:$0xff]  }
  0x2a   :  { %v3782_v25 = vld [vmem:[%s5545_s29 + $0x10] ss:$28 sps:$4 sm:$0xff]   ;;  %v3790_v29 = vld [vmem:[%s5545_s29 + $0x88] ss:$28 sps:$4 sm:$0xff]   ;;  %v4398_v35 = vld [vmem:[%s5546_s28] sm:$0xf] }
  0x2b   :  { %3259 = vmatpush3.bf16.msra.mxu0 %v3710_v30  ;;  %v3786_v26 = vld [vmem:[%s5545_s29 + $0x50] ss:$28 sps:$4 sm:$0xff]   ;;  %v3798_v30 = vld [vmem:[%s5515_s5] sm:$0xff]  }
  0x2c   :  { %3323 = vmatpush3.bf16.msra.mxu1 %v3711_v31  ;;  %3372 = vmatprep.subr.bf16.mxu0 %v3718_v36  ;;  %v3787_v28 = vld [vmem:[%s5515_s5 + $0x8] sm:$0xff]   ;;  %v4403_v36 = vld [vmem:[%s5546_s28 + $0x4] sm:$0xf] }
  0x2d   :  { %3512 = vmatprep.subr.bf16.mxu1 %v3719_v37  ;;  %v3791_v31 = vld [vmem:[%s5545_s29 + $0x48] ss:$28 sps:$4 sm:$0xff]  }
  0x2e   :  { %908 = vmatmul.mubr.bf16.vlgmr.msra.gmra.mxu0 %v3712_v32  ;;  %v3792_v32 = vld [vmem:[%s5545_s29 + $0xc0] ss:$28 sps:$4 sm:$0xff]  }
  0x2f   :  { %1005 = vmatmul.mubr.bf16.vlgmr.msra.gmra.mxu1 %v3715_v34  ;;  %3373 = vmatpush3.bf16.msra.mxu0 %v3720_v38  ;;  %v3795_v34 = vld [vmem:[%s5545_s29 + $0xf8] ss:$28 sps:$4 sm:$0xff]   ;;  %v4413_v38 = vld [vmem:[%s5546_s28 + $0xc] sm:$0xf] }
  0x30   :  { %3513 = vmatpush3.bf16.msra.mxu1 %v3719_v37  ;;  %915 = vmatprep.mubr.bf16.mxu0 %v3721_v39  ;;  %v4408_v37 = vld [vmem:[%s5546_s28 + $0x8] sm:$0xf]  ;;  %v4418_v39 = vld [vmem:[%s5546_s28 + $0x10] sm:$0xf] }
  0x31   :  { %1012 = vmatprep.mubr.bf16.mxu1 %v3723_v40  ;;  %3374 = vmatprep.subr.bf16.mxu0 %v3727_v43  ;;  %v4423_v40 = vld [vmem:[%s5546_s28 + $0x14] sm:$0xf]  ;;  %v2405_v43 = vmax.f32 %v4398_v35, 1e-06 }
  0x32   :  { %3514 = vmatprep.subr.bf16.mxu1 %v3729_v45 }
  0x33   :  { %3375 = vmatpush3.bf16.msra.mxu0 %v3728_v44  ;;  %v2406_v44 = vmax.f32 %v4403_v36, 1e-06 }
  0x34   :  { %3515 = vmatpush3.bf16.msra.mxu1 %v3729_v45  ;;  %3376 = vmatprep.subr.bf16.mxu0 %v3736_v49  ;;  %v2407_v45 = vmax.f32 %v4408_v37, 1e-06 }
  0x35   :  { %3516 = vmatprep.subr.bf16.mxu1 %v3738_v52 }
  0x36   :  { %916 = vmatmul.mubr.bf16.gmra.mxu0 %v3725_v41  ;;  %v4428_v41 = vld [vmem:[%s5546_s28 + $0x18] sm:$0xf] }
  0x37   :  { %1013 = vmatmul.mubr.bf16.gmra.mxu1 %v3726_v42  ;;  %923 = vmatprep.mubr.bf16.mxu0 %v3730_v46  ;;  %v4433_v42 = vld [vmem:[%s5546_s28 + $0x1c] sm:$0xf]  ;;  %v2408_v46 = vmax.f32 %v4413_v38, 1e-06  ;;  %v2411_v49 = vmax.f32 %v4428_v41, 1e-06 }
  0x38   :  { %1020 = vmatprep.mubr.bf16.mxu1 %v3732_v47  ;;  %3377 = vmatpush3.bf16.msra.mxu0 %v3737_v51  ;;  %v2409_v47 = vmax.f32 %v4418_v39, 1e-06  ;;  %v3796_v51 = vld [vmem:[%s5545_s29 + $0x80] ss:$28 sps:$4 sm:$0xff]  }
  0x39   :  { %3517 = vmatpush3.bf16.msra.mxu1 %v3738_v52  ;;  %3378 = vmatprep.subr.bf16.mxu0 %v3745_v55  ;;  %v2412_v52 = vmax.f32 %v4433_v42, 1e-06  ;;  %v2416_v55 = vmul.f32 %v2408_v46, %v2408_v46 }
  0x3a   :  { %3518 = vmatprep.subr.bf16.mxu1 %v3754_v62 }
  0x3c   :  { %3379 = vmatpush3.bf16.msra.mxu0 %v3746_v56  ;;  %v3797_v56 = vld [vmem:[%s5545_s29 + $0x130] ss:$28 sps:$4 sm:$0xff]  }
  0x3d   :  { %3380 = vmatprep.subr.bf16.mxu0 %v3753_v61  ;;  %3519 = vmatpush3.bf16.msra.mxu1 %v3754_v62  ;;  %v3801_v62 = vld [vmem:[%s5545_s29 + $0x168] ss:$28 sps:$4 sm:$0xff]  }
  0x3e   :  { %924 = vmatmul.mubr.bf16.gmra.mxu0 %v3734_v48  ;;  %3520 = vmatprep.subr.bf16.mxu1 %v3764_v4  ;;  %v2410_v48 = vmax.f32 %v4423_v40, 1e-06 }
  0x3f   :  { %1021 = vmatmul.mubr.bf16.gmra.mxu1 %v3735_v50  ;;  %931 = vmatprep.mubr.bf16.mxu0 %v3739_v53  ;;  %v2413_v50 = vmul.f32 %v2405_v43, %v2405_v43  ;;  %v2414_v53 = vmul.f32 %v2406_v44, %v2406_v44 }
  0x40   :  { %1028 = vmatprep.mubr.bf16.mxu1 %v3741_v54  ;;  %3381 = vmatpush3.bf16.msra.mxu0 %v3755_v63  ;;  %v2415_v54 = vmul.f32 %v2407_v45, %v2407_v45  ;;  %v2420_v63 = vmul.f32 %v2412_v52, %v2412_v52 }
  0x41   :  { %3382 = vmatprep.subr.bf16.mxu0 %v3762_v1  ;;  %3521 = vmatpush3.bf16.msra.mxu1 %v3764_v4  ;;  %v2421_v61 = vmul.f32 %v2413_v50, %v2405_v43 }
  0x42   :  { %3522 = vmatprep.subr.bf16.mxu1 %v3773_v9  ;;  %v2423_v1 = vmul.f32 %v2415_v54, %v2407_v45 }
  0x44   :  { %3383 = vmatpush3.bf16.msra.mxu0 %v3763_v3 }
  0x45   :  { %3384 = vmatprep.subr.bf16.mxu0 %v3771_v7  ;;  %3523 = vmatpush3.bf16.msra.mxu1 %v3773_v9 }
  0x46   :  { %932 = vmatmul.mubr.bf16.gmra.mxu0 %v3743_v57  ;;  %3540 = vmatprep.subr.bf16.mxu1 %v5534_v15  ;;  %v3799_v57 = vld [vmem:[%s5545_s29 + $0xbc] ss:$28 sps:$4 sm:$0xff]  }
  0x47   :  { %1029 = vmatmul.mubr.bf16.gmra.mxu1 %v3744_v58  ;;  %939 = vmatprep.mubr.bf16.mxu0 %v3747_v59  ;;  %v2417_v58 = vmul.f32 %v2409_v47, %v2409_v47  ;;  %v2418_v59 = vmul.f32 %v2410_v48, %v2410_v48 }
  0x48   :  { %1036 = vmatprep.mubr.bf16.mxu1 %v3749_v60  ;;  %3385 = vmatpush3.bf16.msra.mxu0 %v3772_v8  ;;  %v2419_v60 = vmul.f32 %v2411_v49, %v2411_v49 }
  0x49   :  { %3386 = vmatprep.subr.bf16.mxu0 %v3780_v14  ;;  %v2425_v3 = vmul.f32 %v2417_v58, %v2409_v47  ;;  %v2426_v4 = vmul.f32 %v2418_v59, %v2410_v48 }
  0x4b   :  { %v2439_v9 = vcombine.low %v2425_v3, %v2426_v4 }
  0x4c   :  { %3387 = vmatpush3.bf16.msra.mxu0 %v3781_v16  ;;  %v3802_v16 = vld [vmem:[%s5545_s29 + $0xb8] ss:$28 sps:$4 sm:$0xff]  }
  0x4d   :  { %v2454_v14 = vsel %vm1640_vm1, %v2439_v9, 0.0 }
  0x4e   :  { %940 = vmatmul.mubr.bf16.gmra.mxu0 %v3751_v0  ;;  %v2422_v0 = vmul.f32 %v2414_v53, %v2406_v44 }
  0x4f   :  { %1037 = vmatmul.mubr.bf16.gmra.mxu1 %v3752_v2  ;;  %947 = vmatprep.mubr.bf16.mxu0 %v3756_v5  ;;  %v2424_v2 = vmul.f32 %v2416_v55, %v2408_v46  ;;  %v2427_v5 = vmul.f32 %v2419_v60, %v2411_v49 }
  0x50   :  { %1044 = vmatprep.mubr.bf16.mxu1 %v3758_v6  ;;  %v2428_v6 = vmul.f32 %v2420_v63, %v2412_v52  ;;  %v2437_v7 = vcombine.low %v2421_v61, %v2422_v0 }
  0x51   :  { %v2438_v8 = vcombine.low %v2423_v1, %v2424_v2 }
  0x56   :  { %948 = vmatmul.mubr.bf16.gmra.mxu0 %v3760_v10  ;;  %v2440_v10 = vcombine.low %v2427_v5, %v2428_v6 }
  0x57   :  { %1045 = vmatmul.mubr.bf16.gmra.mxu1 %v3761_v11  ;;  %955 = vmatprep.mubr.bf16.mxu0 %v3765_v12  ;;  %v2445_v11 = vsel %vm1640_vm1, %v2437_v7, 0.0  ;;  %v2446_v12 = vsel %vm1640_vm1, %v2438_v8, 0.0 }
  0x58   :  { %1052 = vmatprep.mubr.bf16.mxu1 %v3767_v13  ;;  %v2447_v13 = vadd.f32 %v2446_v12, %v2445_v11 }
  0x5e   :  { %956 = vmatmul.mubr.bf16.gmra.mxu0 %v3769_v17  ;;  %v2455_v17 = vsel %vm1640_vm1, %v2440_v10, 0.0 }
  0x5f   :  { %1053 = vmatmul.mubr.bf16.gmra.mxu1 %v3770_v18  ;;  %963 = vmatprep.mubr.bf16.mxu0 %v3774_v19  ;;  %v3803_v18 = vld [vmem:[%s5545_s29 + $0x1a0] ss:$28 sps:$4 sm:$0xff]   ;;  %v3804_v19 = vld [vmem:[%s5545_s29 + $0xf4] ss:$28 sps:$4 sm:$0xff]  }
  0x60   :  { %1060 = vmatprep.mubr.bf16.mxu1 %v3776_v20  ;;  %v2448_v20 = vrot.slane %v2447_v13, 4 }
  0x66   :  { %964 = vmatmul.mubr.bf16.gmra.mxu0 %v3778_v21  ;;  %v2456_v21 = vadd.f32 %v2455_v17, %v2454_v14 }
  0x67   :  { %1061 = vmatmul.mubr.bf16.gmra.mxu1 %v3779_v22  ;;  %1101 = vmatprep.mubr.bf16.mxu0 %v3784_v23  ;;  %v2449_v22 = vadd.f32 %v2448_v20, %v2447_v13 }
  0x68   :  { %3524 = vmatprep.mubr.msk.bf16.mxu1 %vm850_vm0, %v3785_v24  ;;  %v2457_v23 = vrot.slane %v2456_v21, 4 }
  0x69   :  { %v2450_v24 = vrot.slane %v2449_v22, 2 }
  0x6e   :  { %1102 = vmatmul.mubr.bf16.vlgmr.msra.gmra.mxu0 %v3782_v25  ;;  %v2458_v25 = vadd.f32 %v2457_v23, %v2456_v21 }
  0x6f   :  { %3525 = vmatmul.mubr.msk.bf16.vlgmr.msra.gmra.mxu1 %vm850_vm0, %v3786_v26  ;;  %1109 = vmatprep.mubr.bf16.mxu0 %v3788_v27 }
  0x70   :  { %3541 = vmatpush3.bf16.msra.mxu1 %v3787_v28  ;;  %3528 = vmatprep.mubr.msk.bf16.mxu1 %vm850_vm0, %v3790_v29 }
  0x71   :  { %3542 = vmatprep.subr.bf16.mxu1 %v5534_v15 }
  0x74   :  { %3543 = vmatpush3.bf16.msra.mxu1 %v3798_v30 }
  0x75   :  { %3548 = vmatprep.subr.bf16.mxu1 %v5534_v15 }
  0x76   :  { %1110 = vmatmul.mubr.bf16.gmra.mxu0 %v3791_v31 }
  0x77   :  { %3529 = vmatmul.mubr.msk.bf16.gmra.mxu1 %vm850_vm0, %v3792_v32  ;;  %1117 = vmatprep.mubr.bf16.mxu0 %v3793_v33 }
  0x78   :  { %3532 = vmatprep.mubr.msk.bf16.mxu1 %vm850_vm0, %v3795_v34 }
  0x7e   :  { %1118 = vmatmul.mubr.bf16.gmra.mxu0 %v3796_v51 }
  0x7f   :  { %3533 = vmatmul.mubr.msk.bf16.gmra.mxu1 %vm850_vm0, %v3797_v56  ;;  %1125 = vmatprep.mubr.bf16.mxu0 %v3799_v57 }
  0x80   :  { %3536 = vmatprep.mubr.msk.bf16.mxu1 %vm850_vm0, %v3801_v62 }
  0x86   :  { %1126 = vmatmul.mubr.bf16.gmra.mxu0 %v3802_v16 }
  0x87   :  { %25 = vsyncpa [#allocation3], 0  ;;  %3537 = vmatmul.mubr.msk.bf16.gmra.mxu1 %vm850_vm0, %v3803_v18  ;;  %1133 = vmatprep.mubr.bf16.mxu0 %v3804_v19  ;;  %v2451_v26 = vadd.f32 %v2450_v24, %v2449_v22  ;;  %v2459_v27 = vrot.slane %v2458_v25, 2  ;;  %vm3987_vm2 = vmmov 0   ;;  %s5547_s4 = sld [smem:[#allocation9_spill]]  ;;  %vm1288_vm3 = vcmask 261120  }
  0x88   :  { %3544 = vmatprep.mubr.msk.bf16.mxu1 %vm3987_vm2, %v5534_v15  ;;  %v3806_v31 = vld [vmem:[%s5545_s29 + $0xf0] ss:$28 sps:$4 sm:$0xff]   ;;  %v3809_v47 = vld [vmem:[%s5545_s29 + $0x128] ss:$28 sps:$4 sm:$0xff]   ;;  %v3812_v49 = vld [vmem:[%s5545_s29 + $0x160] ss:$28 sps:$4 sm:$0xff]   ;;  %v2376_v23 = vcombine.low %v4398_v35, %v4403_v36  ;;  %v2377_v24 = vcombine.low %v4408_v37, %v4413_v38  ;;  %v2379_v35 = vcombine.low %v4428_v41, %v4433_v42 }
  0x89   :  { %v2452_v29 = vrot.slane %v2451_v26, 1  ;;  %v2460_v30 = vadd.f32 %v2459_v27, %v2458_v25  ;;  %v3807_v33 = vld [vmem:[%s5545_s29 + $0x12c] ss:$28 sps:$4 sm:$0xff]   ;;  %v3810_v48 = vld [vmem:[%s5545_s29 + $0x164] ss:$28 sps:$4 sm:$0xff]   ;;  %vm2479_vm4 = vcmask 1041409   ;;  %v2378_v25 = vcombine.low %v4418_v39, %v4423_v40 }
  0x8a   :  { %v3813_v50 = vld [vmem:[%s5545_s29 + $0x19c] ss:$28 sps:$4 sm:$0xff]   ;;  %vm2482_vm5 = vcmask 517120   ;;  %v1345_v2 = vld [vmem:[%s5518_s8] sm:$0xf]  ;;  %vm1350_vm6 = vcmask 1043456  }
  0x8b   :  { %v2453_v34 = vadd.f32 %v2452_v29, %v2451_v26  ;;  %v2461_v43 = vrot.slane %v2460_v30, 1  ;;  %v3815_v58 = vld [vmem:[%s5545_s29 + $0x198] ss:$28 sps:$4 sm:$0xff]   ;;  %v1352_v3 = vsel %vm1350_vm6, %v1345_v2, 0  ;;  %v3816_v4 = vld [vmem:[%s5517_s7 + $0x8] ss:$0 sps:$4 sm:$0xff]  }
  0x8c   :  { %v4518_v5 = vsel %vm1350_vm6, %v3816_v4, 0  ;;  %s5548_s22 = sld [smem:[#allocation12_spill]]  ;;  %v3822_v26 = vld [vmem:[%s5520_s10 + $0x18] sm:$0xff]   ;;  %v3823_v27 = vld [vmem:[%s5520_s10 + $0x10] sm:$0xff]   ;;  %v2384_v37 = vsel %vm1640_vm1, %v2376_v23, 0.0  ;;  %v2385_v38 = vsel %vm1640_vm1, %v2377_v24, 0.0 }
  0x8d   :  { %v1263_v28 = vld [vmem:[%s5547_s4] sm:$0x3]  ;;  %v2462_v44 = vadd.f32 %v2461_v43, %v2460_v30  ;;  %v2463_v45 = vmul.f32 0.0625, %v2453_v34  ;;  %v2393_v39 = vsel %vm1640_vm1, %v2378_v25, 0.0  ;;  %3574 = vmatprep.subr.bf16.mxu0 %v3822_v26  ;;  %v3824_v41 = vld [vmem:[%s5520_s10 + $0x8] sm:$0xff]   ;;  %vm1346_vm7 = vcmask 64512  }
  0x8e   :  { %v1264_v32 = vpack.c.bf16 %v1263_v28, %v1263_v28  ;;  %1134 = vmatmul.mubr.bf16.gmra.mxu0 %v3806_v31  ;;  %vm1436_vm8 = vcmask 195584   ;;  %s3990_s2 = smov [#allocation2]  }
  0x8f   :  { %1141 = vmatprep.mubr.bf16.mxu0 %v3807_v33  ;;  %v2464_v46 = vmul.f32 0.0625, %v2462_v44  ;;  %3850 = vlog2.f32 %v2463_v45  ;;  %v2394_v33 = vsel %vm1640_vm1, %v2379_v35, 0.0  ;;  %3575 = vmatpush3.bf16.msra.mxu0 %v3822_v26  ;;  %s3052_s25 = sshll.u32 %s3990_s2, 4  ;;  %s3053_s25 = int_to_ptr.vmem [resolvable:$true] %s3052_s25 }
  0x90   :  { %3545 = vmatmul.mubr.msk.bf16.vlgmr.msra.gmra.mxu1 %vm1288_vm3, %v1264_v32  ;;  %v2386_v32 = vadd.f32 %v2385_v38, %v2384_v37  ;;  %v2395_v44 = vadd.f32 %v2394_v33, %v2393_v39  ;;  %3576 = vmatprep.subr.bf16.mxu0 %v3823_v27  ;;  %p3969_p1 = scmp.lt.s32.totalorder %s3053_s25, %s3053_s25 }
  0x91   :  { %3550 = vmatprep.mubr.msk.bf16.mxu1 %vm3987_vm2, %v5534_v15  ;;  %3852 = vlog2.f32 %v2464_v46  ;;  %3549 = vmatpush3.bf16.msra.mxu1 %v1352_v3 }
  0x92   :  { %3674 = vmatprep.subr.msk.bf16.mxu1 %vm1350_vm6, %v3816_v4  ;;  %v4523_v8 = vld [vmem:[%s5548_s22] ss:$0 sm:$0xff]  ;;  %v2387_v46 = vrot.slane %v2386_v32, 4 }
  0x93   :  { %3577 = vmatpush3.bf16.msra.mxu0 %v3823_v27 }
  0x94   :  { %3578 = vmatprep.subr.bf16.mxu0 %v3824_v41 }
  0x96   :  { %1142 = vmatmul.mubr.bf16.gmra.mxu0 %v3809_v47 }
  0x97   :  { %1149 = vmatprep.mubr.bf16.mxu0 %v3810_v48  ;;  %v2396_v48 = vrot.slane %v2395_v44, 4  ;;  %3579 = vmatpush3.bf16.msra.mxu0 %v3824_v41 }
  0x9c   :  { %v3851_v51 = vpop.eup %3850 }
  0x9d   :  { %v2466_v52 = vmul.f32 0.6931472, %v3851_v51 }
  0x9e   :  { %v3853_v53 = vpop.eup %3852  ;;  %1150 = vmatmul.mubr.bf16.gmra.mxu0 %v3812_v49 }
  0x9f   :  { %1157 = vmatprep.mubr.bf16.mxu0 %v3813_v50  ;;  %v2468_v54 = vmul.f32 0.6931472, %v3853_v53  ;;  %v2469_v55 = vmul.f32 0.33333334, %v2466_v52  ;;  %v2388_v52 = vadd.f32 %v2387_v46, %v2386_v32 }
  0xa1   :  { %v2470_v56 = vmul.f32 0.33333334, %v2468_v54  ;;  %v2471_v57 = vmul.f32 1.442695, %v2469_v55  ;;  %v2397_v55 = vadd.f32 %v2396_v48, %v2395_v44 }
  0xa3   :  { %3854 = vpow2.f32 %v2471_v57  ;;  %v2473_v59 = vmul.f32 1.442695, %v2470_v56 }
  0xa5   :  { %3856 = vpow2.f32 %v2473_v59 }
  0xa6   :  { %1158 = vmatmul.mubr.bf16.gmra.mxu0 %v3815_v58  ;;  %v2389_v58 = vrot.slane %v2388_v52, 2 }
  0xa8   :  { %v2390_v2 = vadd.f32 %v2389_v58, %v2388_v52 }
  0xb0   :  { %v4502_v60 = vpop.eup %3854 }
  0xb1   :  { %v2494_v61 = vmul.f32 %v4502_v60, %v4502_v60 }
  0xb2   :  { %v4506_v62 = vpop.eup %3856 }
  0xb3   :  { %v2495_v63 = vmul.f32 %v4506_v62, %v4506_v62 }
  0xb5   :  { %v2498_v0 = vsel %vm2479_vm4, %v2495_v63, %v2494_v61  ;;  %v2398_v61 = vrot.slane %v2397_v55, 2 }
  0xb6   :  { %v2500_v1 = vsel %vm2482_vm5, %v2498_v0, 0.0 }
  0xb7   :  { %2501 = vadd.xlane.f32.xlu0 %v2500_v1 }
  0xee   :  { %v3260_v6 = vpop.f32.mrf.mxu0 }
  0xef   :  { %v3324_v7 = vpop.f32.mrf.mxu1 }
  0xf0   :  { %v3261_v9 = vpop.f32.mrf.mxu0 }
  0xf1   :  { %v3262_v10 = vadd.f32 %v3261_v9, %v3260_v6  ;;  %v3325_v11 = vpop.f32.mrf.mxu1  ;;  %v2399_v6 = vadd.f32 %v2398_v61, %v2397_v55 }
  0xf2   :  { %v3326_v12 = vadd.f32 %v3325_v11, %v3324_v7  ;;  %v3263_v13 = vpop.f32.mrf.mxu0 }
  0xf3   :  { %v910_v14 = vadd.f32 %v3262_v10, %v4523_v8  ;;  %v3327_v16 = vpop.f32.mrf.mxu1  ;;  %v2391_v10 = vrot.slane %v2390_v2, 1 }
  0xf4   :  { %v3264_v17 = vpop.f32.mrf.mxu0 }
  0xf5   :  { %v4526_v18 = vadd.f32 %v3326_v12, %v910_v14  ;;  %v3265_v19 = vadd.f32 %v3264_v17, %v3263_v13  ;;  %v3328_v20 = vpop.f32.mrf.mxu1  ;;  %v2400_v12 = vrot.slane %v2399_v6, 1  ;;  %v2392_v17 = vadd.f32 %v2391_v10, %v2390_v2 }
  0xf6   :  { %v3329_v21 = vadd.f32 %v3328_v20, %v3327_v16  ;;  %v3266_v22 = vpop.f32.mrf.mxu0 }
  0xf7   :  { %v913_v28 = vadd.f32 %v3265_v19, %v4523_v8  ;;  %v3330_v29 = vpop.f32.mrf.mxu1  ;;  %v4562_v24 = vmul.f32 0.0625, %v2392_v17 }
  0xf8   :  { %v3267_v36 = vpop.f32.mrf.mxu0 }
  0xf9   :  { %v4546_v40 = vadd.f32 %v3329_v21, %v913_v28  ;;  %v3268_v30 = vadd.f32 %v3267_v36, %v3266_v22  ;;  %v3331_v31 = vpop.f32.mrf.mxu1  ;;  %v2401_v21 = vadd.f32 %v2400_v12, %v2399_v6  ;;  %v2475_v35 = vmul.f32 %v4562_v24, %v4562_v24 }
  0xfa   :  { %v3332_v34 = vadd.f32 %v3331_v31, %v3330_v29  ;;  %v3269_v43 = vpop.f32.mrf.mxu0 }
  0xfb   :  { %v918_v42 = vadd.f32 %v3268_v30, %v4523_v8  ;;  %v3333_v45 = vpop.f32.mrf.mxu1  ;;  %v4564_v26 = vmul.f32 0.0625, %v2401_v21 }
  0xfc   :  { %v3270_v47 = vpop.f32.mrf.mxu0 }
  0xfd   :  { %v4553_v49 = vadd.f32 %v3332_v34, %v918_v42  ;;  %v3271_v50 = vadd.f32 %v3270_v47, %v3269_v43  ;;  %v3334_v51 = vpop.f32.mrf.mxu1  ;;  %v2476_v38 = vmul.f32 %v4564_v26, %v4564_v26 }
  0xfe   :  { %v3335_v53 = vadd.f32 %v3334_v51, %v3333_v45  ;;  %v3272_v54 = vpop.f32.mrf.mxu0 }
  0xff   :  { %v921_v56 = vadd.f32 %v3271_v50, %v4523_v8  ;;  %v3336_v57 = vpop.f32.mrf.mxu1  ;;  %v2480_v32 = vsel %vm2479_vm4, %v2476_v38, %v2475_v35 }
 0x100   :  { %v3273_v59 = vpop.f32.mrf.mxu0  ;;  %v2483_v44 = vsel %vm2482_vm5, %v2480_v32, 0.0 }
 0x101   :  { %v4556_v63 = vadd.f32 %v3335_v53, %v921_v56  ;;  %v3274_v0 = vadd.f32 %v3273_v59, %v3272_v54  ;;  %v3337_v1 = vpop.f32.mrf.mxu1  ;;  %2484 = vadd.xlane.f32.xlu0 %v2483_v44 }
 0x102   :  { %v3338_v3 = vadd.f32 %v3337_v1, %v3336_v57  ;;  %v3275_v4 = vpop.f32.mrf.mxu0 }
 0x103   :  { %v926_v7 = vadd.f32 %v3274_v0, %v4523_v8  ;;  %v3339_v9 = vpop.f32.mrf.mxu1 }
 0x104   :  { %v3276_v11 = vpop.f32.mrf.mxu0 }
 0x105   :  { %v4559_v13 = vadd.f32 %v3338_v3, %v926_v7  ;;  %v3277_v14 = vadd.f32 %v3276_v11, %v3275_v4  ;;  %v3340_v16 = vpop.f32.mrf.mxu1 }
 0x106   :  { %v3341_v19 = vadd.f32 %v3340_v16, %v3339_v9  ;;  %v3278_v20 = vpop.f32.mrf.mxu0 }
 0x107   :  { %v929_v22 = vadd.f32 %v3277_v14, %v4523_v8  ;;  %v3342_v23 = vpop.f32.mrf.mxu1 }
 0x108   :  { %v3279_v25 = vpop.f32.mrf.mxu0 }
 0x109   :  { %v4566_v27 = vadd.f32 %v3341_v19, %v929_v22  ;;  %v3280_v28 = vadd.f32 %v3279_v25, %v3278_v20  ;;  %v3343_v29 = vpop.f32.mrf.mxu1 }
 0x10a   :  { %v3344_v36 = vadd.f32 %v3343_v29, %v3342_v23  ;;  %v3281_v37 = vpop.f32.mrf.mxu0 }
 0x10b   :  { %v934_v39 = vadd.f32 %v3280_v28, %v4523_v8  ;;  %v3345_v30 = vpop.f32.mrf.mxu1 }
 0x10c   :  { %v3282_v31 = vpop.f32.mrf.mxu0 }
 0x10d   :  { %v4574_v33 = vadd.f32 %v3344_v36, %v934_v39  ;;  %v3283_v34 = vadd.f32 %v3282_v31, %v3281_v37  ;;  %v3346_v43 = vpop.f32.mrf.mxu1 }
 0x10e   :  { %v3347_v41 = vadd.f32 %v3346_v43, %v3345_v30  ;;  %v3284_v42 = vpop.f32.mrf.mxu0 }
 0x10f   :  { %v937_v45 = vadd.f32 %v3283_v34, %v4523_v8  ;;  %v3348_v46 = vpop.f32.mrf.mxu1 }
 0x110   :  { %v3285_v47 = vpop.f32.mrf.mxu0 }
 0x111   :  { %v4578_v48 = vadd.f32 %v3347_v41, %v937_v45  ;;  %v3286_v50 = vadd.f32 %v3285_v47, %v3284_v42  ;;  %v3349_v51 = vpop.f32.mrf.mxu1 }
 0x112   :  { %v3350_v52 = vadd.f32 %v3349_v51, %v3348_v46  ;;  %v3287_v53 = vpop.f32.mrf.mxu0 }
 0x113   :  { %v942_v54 = vadd.f32 %v3286_v50, %v4523_v8  ;;  %v3351_v55 = vpop.f32.mrf.mxu1 }
 0x114   :  { %v3288_v56 = vpop.f32.mrf.mxu0 }
 0x115   :  { %v4581_v57 = vadd.f32 %v3350_v52, %v942_v54  ;;  %v3289_v58 = vadd.f32 %v3288_v56, %v3287_v53  ;;  %v3352_v59 = vpop.f32.mrf.mxu1 }
 0x116   :  { %v3353_v61 = vadd.f32 %v3352_v59, %v3351_v55  ;;  %v3290_v0 = vpop.f32.mrf.mxu0 }
 0x117   :  { %v945_v1 = vadd.f32 %v3289_v58, %v4523_v8  ;;  %v3354_v2 = vpop.f32.mrf.mxu1 }
 0x118   :  { %v3291_v3 = vpop.f32.mrf.mxu0 }
 0x119   :  { %v4584_v4 = vadd.f32 %v3353_v61, %v945_v1  ;;  %v3292_v6 = vadd.f32 %v3291_v3, %v3290_v0  ;;  %v3355_v7 = vpop.f32.mrf.mxu1 }
 0x11a   :  { %v3356_v9 = vadd.f32 %v3355_v7, %v3354_v2  ;;  %v3293_v10 = vpop.f32.mrf.mxu0 }
 0x11b   :  { %v950_v11 = vadd.f32 %v3292_v6, %v4523_v8  ;;  %v3357_v12 = vpop.f32.mrf.mxu1 }
 0x11c   :  { %v3294_v14 = vpop.f32.mrf.mxu0 }
 0x11d   :  { %v4587_v16 = vadd.f32 %v3356_v9, %v950_v11  ;;  %v3295_v17 = vadd.f32 %v3294_v14, %v3293_v10  ;;  %v3358_v19 = vpop.f32.mrf.mxu1 }
 0x11e   :  { %v3359_v20 = vadd.f32 %v3358_v19, %v3357_v12  ;;  %v3296_v21 = vpop.f32.mrf.mxu0 }
 0x11f   :  { %v953_v22 = vadd.f32 %v3295_v17, %v4523_v8  ;;  %v3360_v23 = vpop.f32.mrf.mxu1 }
 0x120   :  { %v3297_v25 = vpop.f32.mrf.mxu0 }
 0x121   :  { %v4590_v28 = vadd.f32 %v3359_v20, %v953_v22  ;;  %v3298_v29 = vadd.f32 %v3297_v25, %v3296_v21  ;;  %v3361_v35 = vpop.f32.mrf.mxu1 }
 0x122   :  { %v3362_v36 = vadd.f32 %v3361_v35, %v3360_v23  ;;  %v4592_v37 = vpop.f32.mrf.mxu0 }
 0x123   :  { %v958_v38 = vadd.f32 %v3298_v29, %v4523_v8  ;;  %v4595_v39 = vpop.f32.mrf.mxu1 }
 0x124   :  { %v4597_v30 = vpop.f32.mrf.mxu0 }
 0x125   :  { %v4599_v31 = vadd.f32 %v3362_v36, %v958_v38  ;;  %v4601_v32 = vpop.f32.mrf.mxu1 }
 0x126   :  { %v3302_v34 = vpop.f32.mrf.mxu0 }
 0x127   :  { %v3366_v43 = vpop.f32.mrf.mxu1 }
 0x128   :  { %v3303_v44 = vpop.f32.mrf.mxu0 }
 0x129   :  { %v3304_v41 = vadd.f32 %v3303_v44, %v3302_v34  ;;  %v3367_v42 = vpop.f32.mrf.mxu1 }
 0x12a   :  { %v3368_v45 = vadd.f32 %v3367_v42, %v3366_v43  ;;  %v4603_v46 = vpop.f32.mrf.mxu0 }
 0x12b   :  { %v966_v47 = vadd.f32 %v3304_v41, %v4523_v8  ;;  %v4606_v50 = vpop.f32.mrf.mxu1 }
 0x12c   :  { %v4608_v51 = vpop.f32.mrf.mxu0 }
 0x12d   :  { %v4610_v52 = vadd.f32 %v3368_v45, %v966_v47  ;;  %v4612_v53 = vpop.f32.mrf.mxu1 }
 0x12e   :  { %v3388_v54 = vpop.f32.mrf.mxu0 }
 0x12f   :  { %v3526_v55 = vpop.f32.mrf.mxu1 }
 0x130   :  { %v3389_v56 = vpop.f32.mrf.mxu0 }
 0x131   :  { %v3390_v58 = vadd.f32 %v3389_v56, %v3388_v54  ;;  %v1200_v59 = vpop.f32.mrf.mxu1 }
 0x132   :  { %v3391_v61 = vpop.f32.mrf.mxu0 }
 0x133   :  { %v3527_v0 = vpop.f32.mrf.mxu1  ;;  %v1104_v2 = vadd.f32 %v3390_v58, %v4526_v18 }
 0x134   :  { %v3392_v1 = vpop.f32.mrf.mxu0 }
 0x135   :  { %v3393_v3 = vadd.f32 %v3392_v1, %v3391_v61  ;;  %v1203_v6 = vpop.f32.mrf.mxu1  ;;  %v4616_v12 = vadd.f32 %v1200_v59, %v1104_v2 }
 0x136   :  { %v3394_v7 = vpop.f32.mrf.mxu0 }
 0x137   :  { %v1107_v9 = vadd.f32 %v3393_v3, %v4546_v40  ;;  %v3530_v10 = vpop.f32.mrf.mxu1 }
 0x138   :  { %v3395_v11 = vpop.f32.mrf.mxu0 }
 0x139   :  { %v4618_v14 = vadd.f32 %v1203_v6, %v1107_v9  ;;  %v3396_v17 = vadd.f32 %v3395_v11, %v3394_v7  ;;  %v1216_v19 = vpop.f32.mrf.mxu1 }
 0x13a   :  { %v3397_v20 = vpop.f32.mrf.mxu0 }
 0x13b   :  { %v1333_v21 = vpack.c.bf16 %v4618_v14, %v4616_v12  ;;  %v3531_v22 = vpop.f32.mrf.mxu1  ;;  %v1112_v18 = vadd.f32 %v3396_v17, %v4553_v49 }
 0x13c   :  { %v3398_v23 = vpop.f32.mrf.mxu0 }
 0x13d   :  { %v3399_v25 = vadd.f32 %v3398_v23, %v3397_v20  ;;  %v1219_v29 = vpop.f32.mrf.mxu1  ;;  %v4626_v43 = vadd.f32 %v3526_v55, %v1112_v18 }
 0x13e   :  { %v3400_v35 = vpop.f32.mrf.mxu0 }
 0x13f   :  { %v1115_v40 = vadd.f32 %v3399_v25, %v4556_v63  ;;  %v4624_v36 = vpop.f32.mrf.mxu1 }
 0x140   :  { %v3401_v38 = vpop.f32.mrf.mxu0  ;;  %v2502_v34 = vpop.xlane.xlu0 %2501 }
 0x141   :  { %v4628_v44 = vadd.f32 %v3527_v0, %v1115_v40  ;;  %v3402_v41 = vadd.f32 %v3401_v38, %v3400_v35  ;;  %v1232_v42 = vpop.f32.mrf.mxu1  ;;  %v2503_v45 = vmax.f32 %v2502_v34, 1e-24 }
 0x142   :  { %v3403_v47 = vpop.f32.mrf.mxu0 }
 0x143   :  { %v1334_v49 = vpack.c.bf16 %v4628_v44, %v4626_v43  ;;  %v4632_v54 = vpop.f32.mrf.mxu1  ;;  %3858 = vrsqrt.f32 %v2503_v45  ;;  %v1120_v63 = vadd.f32 %v3402_v41, %v4559_v13 }
 0x144   :  { %v3404_v56 = vpop.f32.mrf.mxu0 }
 0x145   :  { %v3405_v58 = vadd.f32 %v3404_v56, %v3403_v47  ;;  %v1235_v59 = vpop.f32.mrf.mxu1  ;;  %v1217_v2 = vadd.f32 %v1216_v19, %v1120_v63 }
 0x146   :  { %v3406_v61 = vpop.f32.mrf.mxu0 }
 0x147   :  { %v1123_v55 = vadd.f32 %v3405_v58, %v4566_v27  ;;  %v4636_v0 = vpop.f32.mrf.mxu1  ;;  %v3179_v27 = vld [vmem:[%s5516_s6] ss:$0 sm:$0xff] }
 0x148   :  { %v3407_v1 = vpop.f32.mrf.mxu0 }
 0x149   :  { %v1220_v3 = vadd.f32 %v1219_v29, %v1123_v55  ;;  %v3408_v6 = vadd.f32 %v3407_v1, %v3406_v61  ;;  %v4638_v7 = vpop.f32.mrf.mxu1 }
 0x14a   :  { %v3409_v9 = vpop.f32.mrf.mxu0 }
 0x14b   :  { %v1335_v11 = vpack.c.bf16 %v1220_v3, %v1217_v2  ;;  %v4640_v17 = vpop.f32.mrf.mxu1  ;;  %v1128_v13 = vadd.f32 %v3408_v6, %v4574_v33 }
 0x14c   :  { %v3410_v20 = vpop.f32.mrf.mxu0 }
 0x14d   :  { %v3411_v23 = vadd.f32 %v3410_v20, %v3409_v9  ;;  %v4643_v18 = vpop.f32.mrf.mxu1  ;;  %v1225_v34 = vadd.f32 %v3530_v10, %v1128_v13  ;;  %v3817_v10 = vld [vmem:[%s5517_s7] sm:$0xff]   ;;  %s3988_s7 = smov 64  }
 0x14e   :  { %v3412_v25 = vpop.f32.mrf.mxu0 }
 0x14f   :  { %v1131_v19 = vadd.f32 %v3411_v23, %v4578_v48 }
 0x150   :  { %v1326_v29 = vpop.f32.mrf.mxu1  ;;  %v3859_v35 = vpop.eup %3858 }
 0x151   :  { %v1327_v40 = vadd.f32 %v3179_v27, %v1326_v29  ;;  %v3413_v38 = vpop.f32.mrf.mxu0  ;;  %v1228_v41 = vadd.f32 %v3531_v22, %v1131_v19  ;;  %v2506_v56 = vrot.slane %v3859_v35, 1  ;;  %v2509_v55 = vmul.f32 %v3859_v35, %v4502_v60 }
 0x152   :  { %v3414_v45 = vadd.f32 %v3413_v38, %v3412_v25  ;;  %v3546_v47 = vpop.f32.mrf.mxu1 }
 0x153   :  { %v1332_v33 = vmax.f32 %v1327_v40, 0.0  ;;  %v3415_v63 = vpop.f32.mrf.mxu0  ;;  %v1336_v58 = vpack.c.bf16 %v1228_v41, %v1225_v34  ;;  %v2510_v1 = vmul.f32 %v4506_v62, %v2506_v56  ;;  %v3365_v40 = vadd.f32 %v4601_v32, %v4595_v39 }
 0x154   :  { %v1329_v61 = vpop.f32.mrf.mxu1  ;;  %v1136_v22 = vadd.f32 %v3414_v45, %v4581_v57 }
 0x155   :  { %v1344_v2 = vpack.c.bf16 %v1332_v33, %v1332_v33  ;;  %v3416_v48 = vpop.f32.mrf.mxu0  ;;  %v2518_v9 = vrot.slane %v2510_v1, 7  ;;  %v1398_v61 = vlaneseq }
 0x156   :  { %v3417_v3 = vadd.f32 %v3416_v48, %v3415_v63  ;;  %v3547_v6 = vpop.f32.mrf.mxu1  ;;  %v1233_v57 = vadd.f32 %v1232_v42, %v1136_v22 }
 0x157   :  { %3551 = vmatmul.mubr.msk.bf16.vlgmr.msra.gmra.mxu1 %vm1346_vm7, %v1344_v2  ;;  %v3418_v20 = vpop.f32.mrf.mxu0  ;;  %v2519_v60 = vsel %vm2479_vm4, %v2518_v9, %v2509_v55  ;;  %v4697_v1 = vshrl.u32 %v1398_v61, 7  ;;  %v3828_v61 = vld [vmem:[%s5525_s15 + $0x28] sm:$0xff]  }
 0x158   :  { %v1139_v13 = vadd.f32 %v3417_v3, %v4584_v4  ;;  %3555 = vmatpush3.bf16.msra.mxu1 %v4518_v5  ;;  %3558 = vmatprep.mubr.msk.bf16.mxu1 %vm1436_vm8, %v1333_v21  ;;  %v3301_v5 = vadd.f32 %v4597_v30, %v4592_v37 }
 0x159   :  { %v3419_v62 = vpop.f32.mrf.mxu0  ;;  %3556 = vmatprep.subr.bf16.mxu1 %v3817_v10  ;;  %2520 = vrot.lane.b32.xlu1 %v2519_v60, %s3988_s7  ;;  %5549 = vst [vmem:[#allocation5_spill] sm:$0xff] %v4697_v1  ;;  %v4705_v3 = vsub.s32 0, %v4697_v1 }
 0x15a   :  { %v1236_v23 = vadd.f32 %v1235_v59, %v1139_v13  ;;  %v3420_v27 = vadd.f32 %v3419_v62, %v3418_v20  ;;  %v961_v29 = vadd.f32 %v3301_v5, %v4523_v8 }
 0x15b   :  { %v3421_v25 = vpop.f32.mrf.mxu0 }
 0x15c   :  { %v1337_v19 = vpack.c.bf16 %v1236_v23, %v1233_v57  ;;  %3557 = vmatpush3.bf16.msra.mxu1 %v3817_v10  ;;  %v1144_v12 = vadd.f32 %v3420_v27, %v4587_v16  ;;  %v4711_v23 = vld [vmem:[%s5519_s9] ss:$0 sm:$0xff] }
 0x15d   :  { %v3422_v4 = vpop.f32.mrf.mxu0 }
 0x15e   :  { %v3423_v14 = vadd.f32 %v3422_v4, %v3421_v25  ;;  %v1241_v35 = vadd.f32 %v4624_v36, %v1144_v12 }
 0x15f   :  { %3559 = vmatmul.mubr.msk.bf16.vlgmr.msra.gmra.mxu1 %vm1436_vm8, %v1334_v49  ;;  %v3424_v21 = vpop.f32.mrf.mxu0  ;;  %v1058_v49 = vadd.f32 %v3365_v40, %v961_v29 }
 0x160   :  { %v1147_v42 = vadd.f32 %v3423_v14, %v4590_v28  ;;  %3562 = vmatprep.mubr.msk.bf16.mxu1 %vm1436_vm8, %v1335_v11  ;;  %v3307_v28 = vadd.f32 %v4608_v51, %v4603_v46  ;;  %v3371_v46 = vadd.f32 %v4612_v53, %v4606_v50  ;;  %v3825_v50 = vld [vmem:[%s5520_s10] sm:$0xff]  }
 0x161   :  { %v3425_v59 = vpop.f32.mrf.mxu0  ;;  %3580 = vmatprep.subr.bf16.mxu0 %v3825_v50 }
 0x162   :  { %v1244_v37 = vadd.f32 %v4632_v54, %v1147_v42  ;;  %v3426_v30 = vadd.f32 %v3425_v59, %v3424_v21  ;;  %v969_v41 = vadd.f32 %v3307_v28, %v4523_v8  ;;  %3581 = vmatpush3.bf16.msra.mxu0 %v3825_v50 }
 0x163   :  { %v3427_v16 = vpop.f32.mrf.mxu0  ;;  %3622 = vmatprep.subr.bf16.mxu0 %v5534_v15 }
 0x164   :  { %v1338_v43 = vpack.c.bf16 %v1244_v37, %v1241_v35  ;;  %v1152_v11 = vadd.f32 %v3426_v30, %v4599_v31  ;;  %v1066_v56 = vadd.f32 %v3371_v46, %v969_v41 }
 0x165   :  { %v3428_v44 = vpop.f32.mrf.mxu0 }
 0x166   :  { %v3429_v38 = vadd.f32 %v3428_v44, %v3427_v16  ;;  %v1249_v39 = vadd.f32 %v4638_v7, %v1152_v11 }
 0x167   :  { %3563 = vmatmul.mubr.msk.bf16.gmra.mxu1 %vm1436_vm8, %v1336_v58  ;;  %v3430_v34 = vpop.f32.mrf.mxu0 }
 0x168   :  { %v1155_v36 = vadd.f32 %v3429_v38, %v1058_v49  ;;  %3566 = vmatprep.mubr.msk.bf16.mxu1 %vm1436_vm8, %v1337_v19 }
 0x169   :  { %v3431_v54 = vpop.f32.mrf.mxu0 }
 0x16a   :  { %v1252_v32 = vadd.f32 %v4643_v18, %v1155_v36  ;;  %v3432_v45 = vadd.f32 %v3431_v54, %v3430_v34  ;;  %v3826_v34 = vld [vmem:[%s5525_s15 + $0x38] sm:$0xff]  }
 0x16b   :  { %v3433_v47 = vpop.f32.mrf.mxu0 }
 0x16c   :  { %v1339_v31 = vpack.c.bf16 %v1252_v32, %v1249_v39  ;;  %v1160_v33 = vadd.f32 %v3432_v45, %v4610_v52  ;;  %v3989_v52 = vmov 1966171168  }
 0x16d   :  { %v3434_v51 = vpop.f32.mrf.mxu0  ;;  %v1396_v53 = vunpack.c.l.s4 %v3989_v52 }
 0x16e   :  { %v3435_v63 = vadd.f32 %v3434_v51, %v3433_v47  ;;  %v1257_v8 = vadd.f32 %v4636_v0, %v1160_v33  ;;  %v3827_v51 = vld [vmem:[%s5525_s15 + $0x30] sm:$0xff]  }
 0x16f   :  { %3567 = vmatmul.mubr.msk.bf16.gmra.mxu1 %vm1436_vm8, %v1338_v43  ;;  %v1397_v55 = vunpack.c.0.s8 %v1396_v53 }
 0x170   :  { %v1163_v58 = vadd.f32 %v3435_v63, %v1066_v56  ;;  %3570 = vmatprep.mubr.msk.bf16.mxu1 %vm1436_vm8, %v1339_v31 }
 0x171   :  { %v4700_v0 = vsub.s32 %v1397_v55, %v4697_v1 }
 0x172   :  { %v1260_v7 = vadd.f32 %v4640_v17, %v1163_v58 }
 0x174   :  { %v1340_v18 = vpack.c.bf16 %v1260_v7, %v1257_v8 }
 0x177   :  { %3571 = vmatmul.mubr.msk.bf16.gmra.mxu1 %vm1436_vm8, %v1340_v18 }
 0x18a   :  { %v2485_v25 = vpop.xlane.xlu0 %2484 }
 0x18b   :  { %v2486_v42 = vmax.f32 %v2485_v25, 1e-24 }
 0x18d   :  { %3860 = vrsqrt.f32 %v2486_v42  ;;  %v3830_v42 = vld [vmem:[%s5525_s15 + $0x18] sm:$0xff]  }
 0x217   :  { %v1388_v17 = vpop.f32.mrf.mxu1 }
 0x218   :  { %v1401_v2 = vrot.slane %v1388_v17, %v4700_v0 }
 0x219   :  { %v3552_v48 = vpop.f32.mrf.mxu1 }
 0x21a   :  { %v1409_v22 = vrot.slane %v1401_v2, %v4700_v0  ;;  %v1402_v59 = vcombine.high %v1401_v2, %v1401_v2 }
 0x21b   :  { %v1391_v10 = vpop.f32.mrf.mxu1 }
 0x21c   :  { %v1420_v20 = vrot.slane %v1409_v22, %v4705_v3  ;;  %v1416_v28 = vrot.slane %v1402_v59, %v4700_v0 }
 0x21d   :  { %v3553_v6 = vpop.f32.mrf.mxu1 }
 0x21e   :  { %v1424_v46 = vrot.slane %v1416_v28, %v4705_v3 }
 0x21f   :  { %v3560_v9 = vpop.f32.mrf.mxu1 }
 0x220   :  { %v1507_v62 = vadd.f32 %v3560_v9, %v1420_v20  ;;  %v3861_v9 = vpop.eup %3860 }
 0x221   :  { %v1498_v13 = vpop.f32.mrf.mxu1 }
 0x222   :  { %v1499_v60 = vadd.f32 %v1498_v13, %v1420_v20  ;;  %v1570_v14 = vadd.f32 %v4711_v23, %v1507_v62  ;;  %v3829_v13 = vld [vmem:[%s5525_s15 + $0x20] sm:$0xff]  }
 0x223   :  { %v3561_v57 = vpop.f32.mrf.mxu1 }
 0x224   :  { %v1510_v27 = vadd.f32 %v3561_v57, %v1420_v20  ;;  %v1568_v4 = vadd.f32 %v4711_v23, %v1499_v60  ;;  %v1586_v43 = vmax.f32 %v1570_v14, 0.0 }
 0x225   :  { %v1501_v19 = vpop.f32.mrf.mxu1 }
 0x226   :  { %v1571_v5 = vadd.f32 %v4711_v23, %v1510_v27  ;;  %v1502_v12 = vadd.f32 %v1501_v19, %v1420_v20  ;;  %v1584_v30 = vmax.f32 %v1568_v4, 0.0 }
 0x227   :  { %v3564_v21 = vpop.f32.mrf.mxu1 }
 0x228   :  { %v1569_v29 = vadd.f32 %v4711_v23, %v1502_v12  ;;  %v1587_v35 = vmax.f32 %v1571_v5, 0.0  ;;  %v1523_v44 = vadd.f32 %v3564_v21, %v1420_v20  ;;  %v2489_v12 = vrot.slane %v3861_v9, 1 }
 0x229   :  { %v1514_v37 = vpop.f32.mrf.mxu1 }
 0x22a   :  { %v1585_v16 = vmax.f32 %v1569_v29, 0.0  ;;  %v1515_v40 = vadd.f32 %v1514_v37, %v1420_v20  ;;  %v1601_v36 = vpack.c.bf16 %v1587_v35, %v1586_v43  ;;  %v1574_v45 = vadd.f32 %v4711_v23, %v1523_v44  ;;  %v3831_v44 = vld [vmem:[%s5525_s15 + $0x10] sm:$0xff]  }
 0x22b   :  { %v3565_v49 = vpop.f32.mrf.mxu1 }
 0x22c   :  { %v1600_v11 = vpack.c.bf16 %v1585_v16, %v1584_v30  ;;  %v1526_v38 = vadd.f32 %v3565_v49, %v1420_v20  ;;  %v1572_v41 = vadd.f32 %v4711_v23, %v1515_v40  ;;  %v1590_v7 = vmax.f32 %v1574_v45, 0.0 }
 0x22d   :  { %v1517_v54 = vpop.f32.mrf.mxu1  ;;  %v2493_v40 = vmul.f32 %v2489_v12, %v4564_v26  ;;  %v3832_v26 = vld [vmem:[%s5525_s15 + $0x8] sm:$0xff]  }
 0x22e   :  { %v1575_v39 = vadd.f32 %v4711_v23, %v1526_v38  ;;  %v1518_v32 = vadd.f32 %v1517_v54, %v1420_v20  ;;  %3582 = vmatprep.mubr.msk.bf16.mxu0 %vm1640_vm1, %v1600_v11  ;;  %v1588_v63 = vmax.f32 %v1572_v41, 0.0  ;;  %v2521_v41 = vpop.permute.xlu1 %2520 }
 0x22f   :  { %v3568_v47 = vpop.f32.mrf.mxu1  ;;  %3583 = vmatmul.mubr.msk.bf16.vlgmr.msra.gmra.mxu0 %vm1640_vm1, %v1601_v36  ;;  %v2513_v36 = vrot.slane %v2493_v40, 7 }
 0x230   :  { %v1573_v31 = vadd.f32 %v4711_v23, %v1518_v32  ;;  %3623 = vmatpush3.bf16.msra.mxu0 %v3826_v34  ;;  %v1591_v56 = vmax.f32 %v1575_v39, 0.0  ;;  %v1539_v18 = vadd.f32 %v3568_v47, %v1424_v46  ;;  %v2492_v34 = vmul.f32 %v3861_v9, %v4562_v24  ;;  %v3833_v24 = vld [vmem:[%s5525_s15] sm:$0xff]   ;;  %v3834_v47 = vld [vmem:[%s5523_s13 + $0x18] sm:$0xff]  }
 0x231   :  { %v1530_v33 = vpop.f32.mrf.mxu1  ;;  %3624 = vmatprep.subr.bf16.mxu0 %v5534_v15  ;;  %3598 = vmatprep.subr.bf16.mxu1 %v3834_v47 }
 0x232   :  { %v1589_v58 = vmax.f32 %v1573_v31, 0.0  ;;  %v1531_v8 = vadd.f32 %v1530_v33, %v1424_v46  ;;  %v1603_v55 = vpack.c.bf16 %v1591_v56, %v1590_v7  ;;  %v1578_v22 = vadd.f32 %v4711_v23, %v1539_v18  ;;  %3599 = vmatpush3.bf16.msra.mxu1 %v3834_v47  ;;  %v3836_v31 = vld [vmem:[%s5523_s13 + $0x8] sm:$0xff]   ;;  %v3837_v56 = vld [vmem:[%s5523_s13] sm:$0xff]  }
 0x233   :  { %v3569_v50 = vpop.f32.mrf.mxu1  ;;  %v2514_v39 = vsel %vm2479_vm4, %v2513_v36, %v2492_v34 }
 0x234   :  { %v1602_v52 = vpack.c.bf16 %v1589_v58, %v1588_v63  ;;  %v1542_v53 = vadd.f32 %v3569_v50, %v1424_v46  ;;  %3625 = vmatpush3.bf16.msra.mxu0 %v3827_v51  ;;  %v1576_v2 = vadd.f32 %v4711_v23, %v1531_v8  ;;  %v1594_v19 = vmax.f32 %v1578_v22, 0.0 }
 0x235   :  { %v1533_v17 = vpop.f32.mrf.mxu1  ;;  %3626 = vmatprep.subr.bf16.mxu0 %v5534_v15  ;;  %v2523_v32 = vsel %vm1640_vm1, %v2514_v39, %v2521_v41 }
 0x236   :  { %v1579_v48 = vadd.f32 %v4711_v23, %v1542_v53  ;;  %v1534_v10 = vadd.f32 %v1533_v17, %v1424_v46  ;;  %3586 = vmatprep.mubr.msk.bf16.mxu0 %vm1640_vm1, %v1602_v52  ;;  %v1592_v57 = vmax.f32 %v1576_v2, 0.0  ;;  %v2524_v45 = vpack.c.bf16 %v2523_v32, %v2523_v32 }
 0x237   :  { %v3572_v6 = vpop.f32.mrf.mxu1  ;;  %3587 = vmatmul.mubr.msk.bf16.gmra.mxu0 %vm1640_vm1, %v1603_v55 }
 0x238   :  { %v1577_v20 = vadd.f32 %v4711_v23, %v1534_v10  ;;  %3627 = vmatpush3.bf16.msra.mxu0 %v3828_v61  ;;  %v1595_v60 = vmax.f32 %v1579_v48, 0.0  ;;  %v1555_v4 = vadd.f32 %v3572_v6, %v1424_v46 }
 0x239   :  { %v1546_v62 = vpop.f32.mrf.mxu1  ;;  %3628 = vmatprep.subr.bf16.mxu0 %v5534_v15 }
 0x23a   :  { %v1593_v27 = vmax.f32 %v1577_v20, 0.0  ;;  %v1547_v25 = vadd.f32 %v1546_v62, %v1424_v46  ;;  %v1605_v59 = vpack.c.bf16 %v1595_v60, %v1594_v19  ;;  %v1582_v16 = vadd.f32 %v4711_v23, %v1555_v4 }
 0x23b   :  { %v3573_v5 = vpop.f32.mrf.mxu1 }
 0x23c   :  { %v1604_v14 = vpack.c.bf16 %v1593_v27, %v1592_v57  ;;  %v1558_v21 = vadd.f32 %v3573_v5, %v1424_v46  ;;  %3629 = vmatpush3.bf16.msra.mxu0 %v3829_v13  ;;  %v1580_v35 = vadd.f32 %v4711_v23, %v1547_v25  ;;  %v1598_v38 = vmax.f32 %v1582_v16, 0.0 }
 0x23d   :  { %v1549_v29 = vpop.f32.mrf.mxu1  ;;  %3630 = vmatprep.subr.bf16.mxu0 %v5534_v15 }
 0x23e   :  { %v1583_v37 = vadd.f32 %v4711_v23, %v1558_v21  ;;  %v1550_v30 = vadd.f32 %v1549_v29, %v1424_v46  ;;  %3590 = vmatprep.mubr.msk.bf16.mxu0 %vm1640_vm1, %v1604_v14  ;;  %v1596_v28 = vmax.f32 %v1580_v35, 0.0  ;;  %v3835_v46 = vld [vmem:[%s5523_s13 + $0x10] sm:$0xff]  }
 0x23f   :  { %3591 = vmatmul.mubr.msk.bf16.gmra.mxu0 %vm1640_vm1, %v1605_v59  ;;  %3600 = vmatprep.subr.bf16.mxu1 %v3835_v46 }
 0x240   :  { %v1581_v43 = vadd.f32 %v4711_v23, %v1550_v30  ;;  %3631 = vmatpush3.bf16.msra.mxu0 %v3830_v42  ;;  %v1599_v49 = vmax.f32 %v1583_v37, 0.0  ;;  %3601 = vmatpush3.bf16.msra.mxu1 %v3835_v46 }
 0x241   :  { %3632 = vmatprep.subr.bf16.mxu0 %v5534_v15  ;;  %3602 = vmatprep.subr.bf16.mxu1 %v3836_v31 }
 0x242   :  { %v1597_v11 = vmax.f32 %v1581_v43, 0.0  ;;  %v1607_v23 = vpack.c.bf16 %v1599_v49, %v1598_v38 }
 0x244   :  { %v1606_v54 = vpack.c.bf16 %v1597_v11, %v1596_v28  ;;  %3633 = vmatpush3.bf16.msra.mxu0 %v3831_v44  ;;  %3603 = vmatpush3.bf16.msra.mxu1 %v3836_v31 }
 0x245   :  { %3634 = vmatprep.subr.bf16.mxu0 %v5534_v15  ;;  %3604 = vmatprep.subr.bf16.mxu1 %v3837_v56 }
 0x246   :  { %3594 = vmatprep.mubr.msk.bf16.mxu0 %vm1640_vm1, %v1606_v54 }
 0x247   :  { %3595 = vmatmul.mubr.msk.bf16.gmra.mxu0 %vm1640_vm1, %v1607_v23 }
 0x248   :  { %3635 = vmatpush3.bf16.msra.mxu0 %v3832_v26  ;;  %3638 = vmatprep.mubr.msk.bf16.mxu0 %vm3987_vm2, %v5534_v15 }
 0x249   :  { %3636 = vmatprep.subr.bf16.mxu0 %v5534_v15  ;;  %3605 = vmatpush3.bf16.msra.mxu1 %v3837_v56  ;;  %v3838_v56 = vld [vmem:[%s5526_s16 + $0x18] sm:$0xff]  }
 0x24a   :  { %3654 = vmatprep.subr.bf16.mxu1 %v5534_v15 }
 0x24c   :  { %3637 = vmatpush3.bf16.msra.mxu0 %v3833_v24 }
 0x24d   :  { %3642 = vmatprep.subr.bf16.mxu0 %v5534_v15 }
 0x24f   :  { %3639 = vmatmul.mubr.bf16.vlgmr.msra.gmra.mxu0 %v2524_v45 }
 0x250   :  { %3650 = vmatprep.mubr.msk.bf16.mxu0 %vm3987_vm2, %v5534_v15  ;;  %3643 = vmatpush3.bf16.msra.mxu0 %v3838_v56 }
 0x251   :  { %3644 = vmatprep.subr.bf16.mxu0 %v5534_v15 }
 0x2ef   :  { %v4788_v51 = vpop.f32.mrf.mxu0 }
 0x2f0   :  { %v1765_v52 = vsel %vm1640_vm1, %v4788_v51, 0.0 }
 0x2f1   :  { %v4793_v33 = vpop.f32.mrf.mxu0 }
 0x2f2   :  { %v1762_v8 = vsel %vm1640_vm1, %v4793_v33, 0.0 }
 0x2f3   :  { %v4795_v63 = vpop.f32.mrf.mxu0 }
 0x2f4   :  { %v1767_v55 = vsel %vm1640_vm1, %v4795_v63, 0.0 }
 0x2f5   :  { %v4797_v58 = vpop.f32.mrf.mxu0 }
 0x2f6   :  { %v1763_v7 = vsel %vm1640_vm1, %v4797_v58, 0.0 }
 0x2f7   :  { %v1764_v18 = vadd.f32 %v1763_v7, %v1762_v8  ;;  %v4803_v50 = vpop.f32.mrf.mxu0  ;;  %v3839_v7 = vld [vmem:[%s5526_s16 + $0x10] sm:$0xff]  }
 0x2f8   :  { %v1773_v13 = vsel %vm1640_vm1, %v4803_v50, 0.0  ;;  %3645 = vmatpush3.bf16.msra.mxu0 %v3839_v7 }
 0x2f9   :  { %v1766_v53 = vadd.f32 %v1765_v52, %v1764_v18  ;;  %v4808_v61 = vpop.f32.mrf.mxu0  ;;  %3646 = vmatprep.subr.bf16.mxu0 %v5534_v15 }
 0x2fa   :  { %v1769_v48 = vsel %vm1640_vm1, %v4808_v61, 0.0 }
 0x2fb   :  { %v1768_v17 = vadd.f32 %v1767_v55, %v1766_v53  ;;  %v4812_v2 = vpop.f32.mrf.mxu0  ;;  %v3840_v55 = vld [vmem:[%s5526_s16 + $0x8] sm:$0xff]  }
 0x2fc   :  { %v1775_v57 = vsel %vm1640_vm1, %v4812_v2, 0.0  ;;  %3647 = vmatpush3.bf16.msra.mxu0 %v3840_v55 }
 0x2fd   :  { %v1770_v10 = vadd.f32 %v1769_v48, %v1768_v17  ;;  %v4816_v22 = vpop.f32.mrf.mxu0  ;;  %3648 = vmatprep.subr.bf16.mxu0 %v5534_v15 }
 0x2fe   :  { %v1771_v6 = vsel %vm1640_vm1, %v4816_v22, 0.0 }
 0x2ff   :  { %v1772_v9 = vadd.f32 %v1771_v6, %v1770_v10  ;;  %v4820_v20 = vpop.f32.mrf.mxu0  ;;  %v3841_v10 = vld [vmem:[%s5526_s16] sm:$0xff]  }
 0x300   :  { %v1781_v42 = vsel %vm1640_vm1, %v4820_v20, 0.0  ;;  %3649 = vmatpush3.bf16.msra.mxu0 %v3841_v10 }
 0x301   :  { %v1774_v60 = vadd.f32 %v1773_v13, %v1772_v9  ;;  %v4824_v62 = vpop.f32.mrf.mxu0 }
 0x302   :  { %v1777_v19 = vsel %vm1640_vm1, %v4824_v62, 0.0 }
 0x303   :  { %v1776_v27 = vadd.f32 %v1775_v57, %v1774_v60  ;;  %v4828_v25 = vpop.f32.mrf.mxu0 }
 0x304   :  { %v1783_v35 = vsel %vm1640_vm1, %v4828_v25, 0.0 }
 0x305   :  { %v1778_v4 = vadd.f32 %v1777_v19, %v1776_v27  ;;  %v4832_v5 = vpop.f32.mrf.mxu0 }
 0x306   :  { %v1779_v12 = vsel %vm1640_vm1, %v4832_v5, 0.0 }
 0x307   :  { %v1780_v14 = vadd.f32 %v1779_v12, %v1778_v4  ;;  %v4836_v21 = vpop.f32.mrf.mxu0 }
 0x308   :  { %v1789_v11 = vsel %vm1640_vm1, %v4836_v21, 0.0 }
 0x309   :  { %v1782_v59 = vadd.f32 %v1781_v42, %v1780_v14  ;;  %v4840_v29 = vpop.f32.mrf.mxu0 }
 0x30a   :  { %v1785_v16 = vsel %vm1640_vm1, %v4840_v29, 0.0 }
 0x30b   :  { %v1784_v37 = vadd.f32 %v1783_v35, %v1782_v59  ;;  %v4844_v30 = vpop.f32.mrf.mxu0 }
 0x30c   :  { %v1791_v54 = vsel %vm1640_vm1, %v4844_v30, 0.0 }
 0x30d   :  { %v1786_v40 = vadd.f32 %v1785_v16, %v1784_v37  ;;  %v4848_v43 = vpop.f32.mrf.mxu0 }
 0x30e   :  { %v1787_v44 = vsel %vm1640_vm1, %v4848_v43, 0.0 }
 0x30f   :  { %v1788_v49 = vadd.f32 %v1787_v44, %v1786_v40  ;;  %v4852_v28 = vpop.f32.mrf.mxu0 }
 0x310   :  { %v2629_v38 = vmul.f32 %v4852_v28, %v4852_v28 }
 0x311   :  { %v1790_v34 = vadd.f32 %v1789_v11, %v1788_v49  ;;  %v3640_v36 = vpop.f32.mrf.mxu0 }
 0x312   :  { %v2630_v26 = vsel %vm2482_vm5, %v2629_v38, 0.0 }
 0x313   :  { %v1792_v23 = vadd.f32 %v1791_v54, %v1790_v34  ;;  %2631 = vadd.xlane.f32.xlu1 %v2630_v26  ;;  %v2626_v41 = vpop.f32.mrf.mxu0 }
 0x315   :  { %v1793_v39 = vrot.slane %v1792_v23, 4  ;;  %v3641_v24 = vpop.f32.mrf.mxu0 }
 0x317   :  { %v1794_v32 = vadd.f32 %v1793_v39, %v1792_v23 }
 0x319   :  { %v1795_v45 = vrot.slane %v1794_v32, 2 }
 0x31b   :  { %v1796_v47 = vadd.f32 %v1795_v45, %v1794_v32 }
 0x31d   :  { %v1797_v46 = vrot.slane %v1796_v47, 1 }
 0x31f   :  { %v1798_v31 = vadd.f32 %v1797_v46, %v1796_v47 }
 0x321   :  { %v1800_v8 = vmul.f32 0.0078125, %v1798_v31 }
 0x323   :  { %v4869_v18 = vsub.f32 %v4793_v33, %v1800_v8  ;;  %v4872_v52 = vsub.f32 %v4797_v58, %v1800_v8  ;;  %v4875_v53 = vsub.f32 %v4788_v51, %v1800_v8  ;;  %v4882_v17 = vsub.f32 %v4795_v63, %v1800_v8 }
 0x324   :  { %v4889_v48 = vsub.f32 %v4808_v61, %v1800_v8  ;;  %v4898_v63 = vsub.f32 %v4816_v22, %v1800_v8  ;;  %v4905_v60 = vsub.f32 %v4803_v50, %v1800_v8  ;;  %v4911_v22 = vsub.f32 %v4812_v2, %v1800_v8 }
 0x325   :  { %v1817_v33 = vmul.f32 %v4869_v18, %v4869_v18  ;;  %v1818_v58 = vmul.f32 %v4872_v52, %v4872_v52  ;;  %v1819_v51 = vmul.f32 %v4875_v53, %v4875_v53  ;;  %v1820_v6 = vmul.f32 %v4882_v17, %v4882_v17 }
 0x326   :  { %v1821_v57 = vmul.f32 %v4889_v48, %v4889_v48  ;;  %v1822_v4 = vmul.f32 %v4898_v63, %v4898_v63  ;;  %v4917_v42 = vsub.f32 %v4824_v62, %v1800_v8  ;;  %v1823_v50 = vmul.f32 %v4905_v60, %v4905_v60 }
 0x327   :  { %v1833_v9 = vsel %vm1640_vm1, %v1817_v33, 0.0  ;;  %v1834_v61 = vsel %vm1640_vm1, %v1818_v58, 0.0  ;;  %v1836_v27 = vsel %vm1640_vm1, %v1819_v51, 0.0  ;;  %v1838_v12 = vsel %vm1640_vm1, %v1820_v6, 0.0 }
 0x328   :  { %v1835_v13 = vadd.f32 %v1834_v61, %v1833_v9  ;;  %v1840_v59 = vsel %vm1640_vm1, %v1821_v57, 0.0  ;;  %v4923_v37 = vsub.f32 %v4832_v5, %v1800_v8  ;;  %v1824_v2 = vmul.f32 %v4911_v22, %v4911_v22 }
 0x329   :  { %v1842_v16 = vsel %vm1640_vm1, %v1822_v4, 0.0  ;;  %v4929_v44 = vsub.f32 %v4820_v20, %v1800_v8  ;;  %v1825_v62 = vmul.f32 %v4917_v42, %v4917_v42  ;;  %v1844_v49 = vsel %vm1640_vm1, %v1823_v50, 0.0 }
 0x32a   :  { %v1837_v19 = vadd.f32 %v1836_v27, %v1835_v13  ;;  %v4935_v38 = vsub.f32 %v4828_v25, %v1800_v8  ;;  %v1826_v5 = vmul.f32 %v4923_v37, %v4923_v37  ;;  %v1846_v34 = vsel %vm1640_vm1, %v1824_v2, 0.0  ;;  %v4973_v2 = vld [vmem:[%s5522_s12] ss:$0 sm:$0xff] }
 0x32b   :  { %v1813_v54 = vsub.f32 %v4840_v29, %v1800_v8  ;;  %v1827_v20 = vmul.f32 %v4929_v44, %v4929_v44  ;;  %v1848_v26 = vsel %vm1640_vm1, %v1825_v62, 0.0  ;;  %v1814_v41 = vsub.f32 %v4848_v43, %v1800_v8 }
 0x32c   :  { %v1839_v14 = vadd.f32 %v1838_v12, %v1837_v19  ;;  %v1828_v25 = vmul.f32 %v4935_v38, %v4935_v38  ;;  %v1850_v39 = vsel %vm1640_vm1, %v1826_v5, 0.0  ;;  %v4949_v32 = vsub.f32 %v4836_v21, %v1800_v8 }
 0x32d   :  { %v1829_v45 = vmul.f32 %v1813_v54, %v1813_v54  ;;  %v1852_v29 = vsel %vm1640_vm1, %v1827_v20, 0.0  ;;  %v4953_v46 = vsub.f32 %v4844_v30, %v1800_v8  ;;  %v1830_v31 = vmul.f32 %v1814_v41, %v1814_v41 }
 0x32e   :  { %v1841_v35 = vadd.f32 %v1840_v59, %v1839_v14  ;;  %v1854_v56 = vsel %vm1640_vm1, %v1828_v25, 0.0  ;;  %v1831_v7 = vmul.f32 %v4949_v32, %v4949_v32  ;;  %v1871_v14 = vld [vmem:[%s5521_s11] sm:$0x1] }
 0x32f   :  { %v1856_v55 = vsel %vm1640_vm1, %v1829_v45, 0.0  ;;  %v1832_v21 = vmul.f32 %v4953_v46, %v4953_v46  ;;  %v1858_v58 = vsel %vm1640_vm1, %v1830_v31, 0.0 }
 0x330   :  { %v1843_v40 = vadd.f32 %v1842_v16, %v1841_v35  ;;  %v1860_v10 = vsel %vm1640_vm1, %v1831_v7, 0.0 }
 0x331   :  { %v1862_v8 = vsel %vm1640_vm1, %v1832_v21, 0.0 }
 0x332   :  { %v1845_v11 = vadd.f32 %v1844_v49, %v1843_v40 }
 0x334   :  { %v1847_v36 = vadd.f32 %v1846_v34, %v1845_v11 }
 0x336   :  { %v1849_v23 = vadd.f32 %v1848_v26, %v1847_v36 }
 0x338   :  { %v1851_v24 = vadd.f32 %v1850_v39, %v1849_v23 }
 0x33a   :  { %v1853_v47 = vadd.f32 %v1852_v29, %v1851_v24 }
 0x33c   :  { %v1855_v43 = vadd.f32 %v1854_v56, %v1853_v47 }
 0x33e   :  { %v1857_v33 = vadd.f32 %v1856_v55, %v1855_v43 }
 0x340   :  { %v1859_v51 = vadd.f32 %v1858_v58, %v1857_v33 }
 0x342   :  { %v1861_v30 = vadd.f32 %v1860_v10, %v1859_v51 }
 0x344   :  { %v1863_v6 = vadd.f32 %v1862_v8, %v1861_v30 }
 0x346   :  { %v1864_v9 = vrot.slane %v1863_v6, 4 }
 0x348   :  { %v1865_v61 = vadd.f32 %v1864_v9, %v1863_v6 }
 0x34a   :  { %v1866_v13 = vrot.slane %v1865_v61, 2 }
 0x34c   :  { %v1867_v57 = vadd.f32 %v1866_v13, %v1865_v61 }
 0x34e   :  { %v1868_v27 = vrot.slane %v1867_v57, 1 }
 0x350   :  { %v1869_v19 = vadd.f32 %v1868_v27, %v1867_v57 }
 0x352   :  { %v1870_v4 = vmul.f32 0.0078125, %v1869_v19 }
 0x354   :  { %v1872_v12 = vadd.f32 1e-05, %v1870_v4 }
 0x356   :  { %3862 = vrsqrt.f32 %v1872_v12 }
 0x363   :  { %v3863_v50 = vpop.eup %3862 }
 0x364   :  { %v1874_v59 = vmul.f32 %v3863_v50, %v1871_v14 }
 0x366   :  { %v4968_v35 = vrot.slane %v1874_v59, %v4705_v3 }
 0x368   :  { %v1894_v16 = vmul.f32 %v4968_v35, %v1814_v41  ;;  %v1893_v40 = vmul.f32 %v4968_v35, %v1813_v54  ;;  %v1881_v62 = vmul.f32 %v4968_v35, %v4869_v18  ;;  %v1882_v49 = vmul.f32 %v4968_v35, %v4872_v52 }
 0x369   :  { %v1883_v11 = vmul.f32 %v4968_v35, %v4875_v53  ;;  %v1884_v5 = vmul.f32 %v4968_v35, %v4882_v17  ;;  %v1885_v34 = vmul.f32 %v4968_v35, %v4889_v48  ;;  %v1886_v36 = vmul.f32 %v4968_v35, %v4898_v63 }
 0x36a   :  { %v4990_v54 = vadd.f32 %v4973_v2, %v1894_v16  ;;  %v4993_v18 = vadd.f32 %v4973_v2, %v1893_v40  ;;  %v4996_v52 = vadd.f32 %v4973_v2, %v1881_v62  ;;  %v4999_v53 = vadd.f32 %v4973_v2, %v1882_v49 }
 0x36b   :  { %v5002_v17 = vadd.f32 %v4973_v2, %v1883_v11  ;;  %v5005_v48 = vadd.f32 %v4973_v2, %v1884_v5  ;;  %v5008_v63 = vadd.f32 %v4973_v2, %v1885_v34  ;;  %v5011_v20 = vadd.f32 %v4973_v2, %v1886_v36 }
 0x36c   :  { %v2244_v26 = vmul.f32 %v4993_v18, %v4993_v18  ;;  %v2232_v23 = vmul.f32 %v4996_v52, %v4996_v52  ;;  %v1920_v41 = vmax.f32 %v4996_v52, 0.0  ;;  %v1921_v25 = vmax.f32 %v4999_v53, 0.0 }
 0x36d   :  { %v1922_v39 = vmax.f32 %v5002_v17, 0.0  ;;  %v1923_v24 = vmax.f32 %v5005_v48, 0.0  ;;  %v1924_v45 = vmax.f32 %v5008_v63, 0.0  ;;  %v1925_v29 = vmax.f32 %v5011_v20, 0.0 }
 0x36e   :  { %v2284_v47 = vsel %vm1640_vm1, %v2244_v26, 0.0  ;;  %v2248_v31 = vsel %vm1640_vm1, %v2232_v23, 0.0  ;;  %v1936_v56 = vpack.c.bf16 %v1921_v25, %v1920_v41  ;;  %v2245_v43 = vmul.f32 %v4990_v54, %v4990_v54 }
 0x36f   :  { %2285 = vadd.xlane.f32.xlu1 %v2284_v47  ;;  %2249 = vadd.xlane.f32.xlu0 %v2248_v31  ;;  %v1937_v7 = vpack.c.bf16 %v1923_v24, %v1922_v39  ;;  %v2233_v55 = vmul.f32 %v4999_v53, %v4999_v53  ;;  %v1938_v33 = vpack.c.bf16 %v1925_v29, %v1924_v45  ;;  %v1932_v26 = vmax.f32 %v4993_v18, 0.0 }
 0x370   :  { %3606 = vmatprep.mubr.msk.bf16.mxu1 %vm1640_vm1, %v1936_v56  ;;  %v1895_v21 = vmul.f32 %v4968_v35, %v4949_v32  ;;  %v1889_v58 = vmul.f32 %v4968_v35, %v4917_v42  ;;  %v1887_v51 = vmul.f32 %v4968_v35, %v4905_v60  ;;  %v2287_v10 = vsel %vm1640_vm1, %v2245_v43, 0.0 }
 0x371   :  { %3607 = vmatmul.mubr.msk.bf16.vlgmr.msra.gmra.mxu1 %vm1640_vm1, %v1937_v7  ;;  %v1888_v30 = vmul.f32 %v4968_v35, %v4911_v22  ;;  %v1890_v8 = vmul.f32 %v4968_v35, %v4923_v37  ;;  %v1896_v6 = vmul.f32 %v4968_v35, %v4953_v46  ;;  %v2251_v42 = vsel %vm1640_vm1, %v2233_v55, 0.0 }
 0x372   :  { %3610 = vmatprep.mubr.msk.bf16.mxu1 %vm1640_vm1, %v1938_v33  ;;  %v5047_v32 = vadd.f32 %v4973_v2, %v1895_v21  ;;  %v5050_v60 = vadd.f32 %v4973_v2, %v1889_v58  ;;  %v5053_v9 = vadd.f32 %v4973_v2, %v1887_v51  ;;  %v1891_v16 = vmul.f32 %v4968_v35, %v4929_v44 }
 0x373   :  { %2288 = vadd.xlane.f32.xlu1 %v2287_v10  ;;  %2252 = vadd.xlane.f32.xlu0 %v2251_v42  ;;  %v5056_v22 = vadd.f32 %v4973_v2, %v1888_v30  ;;  %v5059_v37 = vadd.f32 %v4973_v2, %v1890_v8  ;;  %v5062_v46 = vadd.f32 %v4973_v2, %v1896_v6  ;;  %v1933_v23 = vmax.f32 %v4990_v54, 0.0 }
 0x374   :  { %v2246_v61 = vmul.f32 %v5047_v32, %v5047_v32  ;;  %v2240_v13 = vmul.f32 %v5050_v60, %v5050_v60  ;;  %v1926_v57 = vmax.f32 %v5053_v9, 0.0  ;;  %v1928_v27 = vmax.f32 %v5050_v60, 0.0 }
 0x375   :  { %5550 = vst [vmem:[#allocation6_spill] sm:$0xff] %v5056_v22  ;;  %5551 = vst [vmem:[#allocation7_spill] sm:$0xff] %v5062_v46  ;;  %v1927_v19 = vmax.f32 %v5056_v22, 0.0  ;;  %v1929_v4 = vmax.f32 %v5059_v37, 0.0  ;;  %v2247_v12 = vmul.f32 %v5062_v46, %v5062_v46  ;;  %v2241_v59 = vmul.f32 %v5059_v37, %v5059_v37 }
 0x376   :  { %v2290_v14 = vsel %vm1640_vm1, %v2246_v61, 0.0  ;;  %v2272_v50 = vsel %vm1640_vm1, %v2240_v13, 0.0  ;;  %v1892_v49 = vmul.f32 %v4968_v35, %v4935_v38  ;;  %v5083_v11 = vadd.f32 %v4973_v2, %v1891_v16  ;;  %v5132_v16 = vld [vmem:[%s5524_s14] ss:$0 sm:$0xff] }
 0x377   :  { %2291 = vadd.xlane.f32.xlu1 %v2290_v14  ;;  %2273 = vadd.xlane.f32.xlu0 %v2272_v50  ;;  %v1939_v40 = vpack.c.bf16 %v1927_v19, %v1926_v57  ;;  %v1940_v62 = vpack.c.bf16 %v1929_v4, %v1928_v27  ;;  %v2293_v5 = vsel %vm1640_vm1, %v2247_v12, 0.0  ;;  %v2275_v34 = vsel %vm1640_vm1, %v2241_v59, 0.0 }
 0x378   :  { %v2234_v44 = vmul.f32 %v5002_v17, %v5002_v17  ;;  %v5092_v36 = vadd.f32 %v4973_v2, %v1892_v49  ;;  %v1930_v38 = vmax.f32 %v5083_v11, 0.0  ;;  %v2242_v25 = vmul.f32 %v5083_v11, %v5083_v11 }
 0x379   :  { %3611 = vmatmul.mubr.msk.bf16.gmra.mxu1 %vm1640_vm1, %v1939_v40  ;;  %v1942_v24 = vpack.c.bf16 %v1933_v23, %v1932_v26  ;;  %v2235_v45 = vmul.f32 %v5005_v48, %v5005_v48  ;;  %v1934_v29 = vmax.f32 %v5047_v32, 0.0  ;;  %v1935_v47 = vmax.f32 %v5062_v46, 0.0 }
 0x37a   :  { %3614 = vmatprep.mubr.msk.bf16.mxu1 %vm1640_vm1, %v1940_v62  ;;  %v1931_v35 = vmax.f32 %v5092_v36, 0.0  ;;  %v2254_v41 = vsel %vm1640_vm1, %v2234_v44, 0.0  ;;  %v2278_v2 = vsel %vm1640_vm1, %v2242_v25, 0.0  ;;  %v2243_v56 = vmul.f32 %v5092_v36, %v5092_v36 }
 0x37b   :  { %2294 = vadd.xlane.f32.xlu1 %v2293_v5  ;;  %2276 = vadd.xlane.f32.xlu0 %v2275_v34  ;;  %v2257_v31 = vsel %vm1640_vm1, %v2235_v45, 0.0  ;;  %v1943_v43 = vpack.c.bf16 %v1935_v47, %v1934_v29  ;;  %v2236_v55 = vmul.f32 %v5008_v63, %v5008_v63  ;;  %v2237_v21 = vmul.f32 %v5011_v20, %v5011_v20 }
 0x37c   :  { %v1941_v39 = vpack.c.bf16 %v1931_v35, %v1930_v38  ;;  %v2281_v7 = vsel %vm1640_vm1, %v2243_v56, 0.0  ;;  %v2238_v51 = vmul.f32 %v5053_v9, %v5053_v9  ;;  %v2239_v30 = vmul.f32 %v5056_v22, %v5056_v22 }
 0x37d   :  { %v2260_v33 = vsel %vm1640_vm1, %v2236_v55, 0.0  ;;  %v2263_v58 = vsel %vm1640_vm1, %v2237_v21, 0.0 }
 0x37e   :  { %v2266_v10 = vsel %vm1640_vm1, %v2238_v51, 0.0  ;;  %v2269_v42 = vsel %vm1640_vm1, %v2239_v30, 0.0 }
 0x37f   :  { %2255 = vadd.xlane.f32.xlu0 %v2254_v41 }
 0x381   :  { %3615 = vmatmul.mubr.msk.bf16.gmra.mxu1 %vm1640_vm1, %v1941_v39 }
 0x382   :  { %3618 = vmatprep.mubr.msk.bf16.mxu1 %vm1640_vm1, %v1942_v24 }
 0x383   :  { %2279 = vadd.xlane.f32.xlu0 %v2278_v2 }
 0x387   :  { %2258 = vadd.xlane.f32.xlu0 %v2257_v31 }
 0x389   :  { %3619 = vmatmul.mubr.msk.bf16.gmra.mxu1 %vm1640_vm1, %v1943_v43 }
 0x38a   :  { %3670 = vmatprep.mubr.msk.bf16.mxu1 %vm3987_vm2, %v5534_v15 }
 0x38b   :  { %2282 = vadd.xlane.f32.xlu0 %v2281_v7 }
 0x38f   :  { %2261 = vadd.xlane.f32.xlu0 %v2260_v33 }
 0x393   :  { %2264 = vadd.xlane.f32.xlu0 %v2263_v58 }
 0x397   :  { %2267 = vadd.xlane.f32.xlu0 %v2266_v10 }
 0x39b   :  { %2270 = vadd.xlane.f32.xlu0 %v2269_v42 }
 0x39c   :  { %v2632_v8 = vpop.xlane.xlu1 %2631 }
 0x39d   :  { %v2633_v6 = vmax.f32 %v2632_v8, 1e-24 }
 0x39f   :  { %3864 = vrsqrt.f32 %v2633_v6 }
 0x3ac   :  { %v3865_v61 = vpop.eup %3864 }
 0x3ad   :  { %v2635_v13 = vmul.f32 %v3865_v61, %v4852_v28 }
 0x3af   :  { %v2636_v57 = vpack.c.bf16 %v2635_v13, %v2635_v13 }
 0x3b1   :  { %3651 = vmatmul.mubr.msk.bf16.vlgmr.msra.gmra.mxu0 %vm1640_vm1, %v2636_v57 }
 0x3f8   :  { %v2250_v27 = vpop.xlane.xlu0 %2249  ;;  %v2286_v59 = vpop.xlane.xlu1 %2285 }
 0x3f9   :  { %v2308_v23 = vmax.f32 %v2286_v59, 1e-24  ;;  %v2296_v39 = vmax.f32 %v2250_v27, 1e-24 }
 0x3fb   :  { %3866 = vrsqrt.f32 %v2308_v23 }
 0x3fc   :  { %v2253_v19 = vpop.xlane.xlu0 %2252  ;;  %v2289_v44 = vpop.xlane.xlu1 %2288  ;;  %3868 = vrsqrt.f32 %v2296_v39 }
 0x3fd   :  { %v2309_v2 = vmax.f32 %v2289_v44, 1e-24  ;;  %v2297_v56 = vmax.f32 %v2253_v19, 1e-24 }
 0x3ff   :  { %3870 = vrsqrt.f32 %v2309_v2 }
 0x400   :  { %v2274_v12 = vpop.xlane.xlu0 %2273  ;;  %v2292_v43 = vpop.xlane.xlu1 %2291 }
 0x401   :  { %v2310_v30 = vmax.f32 %v2292_v43, 1e-24  ;;  %v2304_v6 = vmax.f32 %v2274_v12, 1e-24 }
 0x404   :  { %v5134_v62 = vpop.xlane.xlu0 %2276 }
 0x405   :  { %v2305_v44 = vmax.f32 %v5134_v62, 1e-24 }
 0x408   :  { %v5148_v41 = vpop.xlane.xlu0 %2255  ;;  %v5188_v43 = vpop.eup %3866 }
 0x40c   :  { %v2280_v21 = vpop.xlane.xlu0 %2279 }
 0x431   :  { %v3608_v4 = vpop.f32.mrf.mxu1 }
 0x432   :  { %v5137_v28 = vadd.f32 %v3608_v4, %v5132_v16 }
 0x433   :  { %v2041_v14 = vpop.f32.mrf.mxu1 }
 0x434   :  { %v5140_v34 = vadd.f32 %v5132_v16, %v2041_v14  ;;  %v2122_v26 = vmin.f32 %v5137_v28, 20.0  ;;  %vm2106_vm9 = vcmp.gt.f32.partialorder %v5137_v28, 20.0 }
 0x435   :  { %v3609_v50 = vpop.f32.mrf.mxu1 }
 0x436   :  { %v2120_v24 = vmin.f32 %v5140_v34, 20.0  ;;  %v5152_v45 = vadd.f32 %v3609_v50, %v5132_v16  ;;  %v2140_v31 = vmul.f32 1.442695, %v2122_v26  ;;  %v2259_v50 = vpop.xlane.xlu0 %2258  ;;  %vm2104_vm10 = vcmp.gt.f32.partialorder %v5140_v34, 20.0 }
 0x437   :  { %v2044_v40 = vpop.f32.mrf.mxu1 }
 0x438   :  { %v5143_v38 = vadd.f32 %v5132_v16, %v2044_v40  ;;  %v2136_v33 = vmul.f32 1.442695, %v2120_v24  ;;  %v2123_v58 = vmin.f32 %v5152_v45, 20.0  ;;  %3872 = vpow2.f32 %v2140_v31 }
 0x439   :  { %v3612_v49 = vpop.f32.mrf.mxu1  ;;  %3874 = vrsqrt.f32 %v2297_v56  ;;  %v2298_v24 = vmax.f32 %v5148_v41, 1e-24  ;;  %vm2107_vm11 = vcmp.gt.f32.partialorder %v5152_v45, 20.0 }
 0x43a   :  { %v2121_v29 = vmin.f32 %v5143_v38, 20.0  ;;  %3876 = vpow2.f32 %v2136_v33  ;;  %v2142_v27 = vmul.f32 1.442695, %v2123_v58  ;;  %v5177_v26 = vadd.f32 %v3612_v49, %v5132_v16 }
 0x43b   :  { %v2057_v5 = vpop.f32.mrf.mxu1  ;;  %v2299_v58 = vmax.f32 %v2259_v50, 1e-24  ;;  %vm2105_vm12 = vcmp.gt.f32.partialorder %v5143_v38, 20.0 }
 0x43c   :  { %v2138_v51 = vmul.f32 1.442695, %v2121_v29  ;;  %v5160_v8 = vadd.f32 %v5132_v16, %v2057_v5  ;;  %v2126_v41 = vmin.f32 %v5177_v26, 20.0  ;;  %vm2110_vm7 = vcmp.gt.f32.partialorder %v5177_v26, 20.0 }
 0x43d   :  { %v5145_v35 = vpop.f32.mrf.mxu1 }
 0x43e   :  { %3878 = vpow2.f32 %v2138_v51  ;;  %v2124_v4 = vmin.f32 %v5160_v8, 20.0  ;;  %v5196_v51 = vpop.xlane.xlu0 %2282  ;;  %v5209_v50 = vadd.f32 %v5145_v35, %v5132_v16  ;;  %vm2108_vm15 = vcmp.gt.f32.partialorder %v5160_v8, 20.0 }
 0x43f   :  { %v2060_v25 = vpop.f32.mrf.mxu1  ;;  %3880 = vrsqrt.f32 %v2310_v30 }
 0x440   :  { %3882 = vrsqrt.f32 %v2304_v6  ;;  %v5184_v2 = vadd.f32 %v5132_v16, %v2060_v25  ;;  %v5194_v25 = vpop.eup %3868 }
 0x441   :  { %v3616_v47 = vpop.f32.mrf.mxu1  ;;  %3884 = vpow2.f32 %v2142_v27  ;;  %v5199_v30 = vpop.eup %3870 }
 0x442   :  { %v5156_v7 = vadd.f32 %v3616_v47, %v5132_v16  ;;  %v2144_v47 = vmul.f32 1.442695, %v2124_v4 }
 0x443   :  { %v2073_v55 = vpop.f32.mrf.mxu1 }
 0x444   :  { %v2130_v42 = vmin.f32 %v5156_v7, 20.0  ;;  %v5171_v14 = vadd.f32 %v5132_v16, %v2073_v55  ;;  %v2306_v55 = vmax.f32 %v2280_v21, 1e-24  ;;  %vm2114_vm14 = vcmp.gt.f32.partialorder %v5156_v7, 20.0 }
 0x445   :  { %v3617_v10 = vpop.f32.mrf.mxu1  ;;  %v3873_v21 = vpop.eup %3872 }
 0x446   :  { %v5164_v61 = vadd.f32 %v3617_v10, %v5132_v16  ;;  %v2156_v59 = vmul.f32 1.442695, %v2130_v42  ;;  %v2128_v31 = vmin.f32 %v5171_v14, 20.0  ;;  %v2125_v10 = vmin.f32 %v5184_v2, 20.0  ;;  %v5205_v4 = vpop.eup %3874 }
 0x447   :  { %v2076_v13 = vpop.f32.mrf.mxu1  ;;  %vm2112_vm2 = vcmp.gt.f32.partialorder %v5171_v14, 20.0 }
 0x448   :  { %v5167_v57 = vadd.f32 %v5132_v16, %v2076_v13  ;;  %v2131_v40 = vmin.f32 %v5164_v61, 20.0  ;;  %v2152_v6 = vmul.f32 1.442695, %v2128_v31  ;;  %vm2115_vm0 = vcmp.gt.f32.partialorder %v5164_v61, 20.0 }
 0x449   :  { %v3620_v19 = vpop.f32.mrf.mxu1 }
 0x44a   :  { %v2129_v12 = vmin.f32 %v5167_v57, 20.0  ;;  %v2158_v62 = vmul.f32 1.442695, %v2131_v40  ;;  %v5202_v42 = vadd.f32 %v3620_v19, %v5132_v16  ;;  %v2146_v40 = vmul.f32 1.442695, %v2125_v10 }
 0x44b   :  { %v2089_v5 = vpop.f32.mrf.mxu1  ;;  %vm2113_vm13 = vcmp.gt.f32.partialorder %v5167_v57, 20.0 }
 0x44c   :  { %v2154_v23 = vmul.f32 1.442695, %v2129_v12  ;;  %v5180_v39 = vadd.f32 %v5132_v16, %v2089_v5  ;;  %v2148_v12 = vmul.f32 1.442695, %v2126_v41  ;;  %v2134_v19 = vmin.f32 %v5202_v42, 20.0 }
 0x44d   :  { %v3621_v29 = vpop.f32.mrf.mxu1  ;;  %vm2118_vm8 = vcmp.gt.f32.partialorder %v5202_v42, 20.0 }
 0x44e   :  { %3886 = vpow2.f32 %v2154_v23  ;;  %v2132_v49 = vmin.f32 %v5180_v39, 20.0  ;;  %v5213_v23 = vadd.f32 %v3621_v29, %v5132_v16  ;;  %v2164_v41 = vmul.f32 1.442695, %v2134_v19 }
 0x44f   :  { %3888 = vpow2.f32 %v2156_v59  ;;  %v2092_v56 = vpop.f32.mrf.mxu1  ;;  %v3877_v59 = vpop.eup %3876  ;;  %vm2116_vm3 = vcmp.gt.f32.partialorder %v5180_v39, 20.0 }
 0x450   :  { %3890 = vrsqrt.f32 %v2305_v44  ;;  %v5192_v33 = vadd.f32 %v5132_v16, %v2092_v56  ;;  %v2160_v13 = vmul.f32 1.442695, %v2132_v49  ;;  %v3879_v5 = vpop.eup %3878  ;;  %v2170_v44 = vadd.f32 1.0, %v3873_v21 }
 0x451   :  { %3892 = vrsqrt.f32 %v2298_v24  ;;  %v5215_v24 = vpop.eup %3880  ;;  %v2168_v35 = vadd.f32 1.0, %v3877_v59  ;;  %v2127_v49 = vmin.f32 %v5209_v50, 20.0  ;;  %v2169_v56 = vadd.f32 1.0, %v3879_v5 }
 0x452   :  { %3894 = vpow2.f32 %v2144_v47  ;;  %v2133_v27 = vmin.f32 %v5192_v33, 20.0  ;;  %v2262_v47 = vpop.xlane.xlu0 %2261  ;;  %vm2117_vm6 = vcmp.gt.f32.partialorder %v5192_v33, 20.0 }
 0x453   :  { %3896 = vpow2.f32 %v2158_v62  ;;  %v5217_v62 = vpop.eup %3882  ;;  %v2150_v10 = vmul.f32 1.442695, %v2127_v49 }
 0x454   :  { %3898 = vrsqrt.f32 %v2306_v55  ;;  %v2162_v31 = vmul.f32 1.442695, %v2133_v27  ;;  %v3885_v55 = vpop.eup %3884 }
 0x455   :  { %3900 = vrsqrt.f32 %v2299_v58  ;;  %v2135_v58 = vmin.f32 %v5213_v23, 20.0  ;;  %v2171_v59 = vadd.f32 1.0, %v3885_v55 }
 0x456   :  { %3902 = vpow2.f32 %v2152_v6  ;;  %v2265_v27 = vpop.xlane.xlu0 %2264 }
 0x457   :  { %3904 = vpow2.f32 %v2160_v13  ;;  %v2295_v13 = vpop.xlane.xlu1 %2294  ;;  %v2166_v5 = vmul.f32 1.442695, %v2135_v58 }
 0x458   :  { %3906 = vpow2.f32 %v2148_v12  ;;  %v2311_v19 = vmax.f32 %v2295_v13, 1e-24 }
 0x459   :  { %3908 = vpow2.f32 %v2146_v40 }
 0x45a   :  { %3910 = vlog2.f32 %v2170_v44  ;;  %v2268_v22 = vpop.xlane.xlu0 %2267 }
 0x45b   :  { %v3887_v16 = vpop.eup %3886  ;;  %3912 = vpow2.f32 %v2162_v31  ;;  %v2307_v31 = vmax.f32 %v5196_v51, 1e-24 }
 0x45c   :  { %v3889_v29 = vpop.eup %3888  ;;  %3914 = vlog2.f32 %v2168_v35  ;;  %v2177_v6 = vadd.f32 1.0, %v3887_v16 }
 0x45d   :  { %v3891_v21 = vpop.eup %3890  ;;  %3916 = vlog2.f32 %v2169_v56  ;;  %v2178_v15 = vadd.f32 1.0, %v3889_v29  ;;  %v2301_v29 = vmax.f32 %v2265_v27, 1e-24  ;;  %v2329_v27 = vmul.f32 %v5205_v4, %v4999_v53 }
 0x45e   :  { %v3893_v12 = vpop.eup %3892  ;;  %3918 = vpow2.f32 %v2164_v41  ;;  %v2300_v41 = vmax.f32 %v2262_v47, 1e-24  ;;  %v5222_v46 = vpop.xlane.xlu0 %2270 }
 0x45f   :  { %v3895_v40 = vpop.eup %3894  ;;  %3920 = vlog2.f32 %v2177_v6 }
 0x460   :  { %v3897_v44 = vpop.eup %3896  ;;  %3922 = vpow2.f32 %v2150_v10  ;;  %v2172_v49 = vadd.f32 1.0, %v3895_v40  ;;  %v2302_v40 = vmax.f32 %v2268_v22, 1e-24  ;;  %v3229_v22 = vld [vmem:[%s5527_s17] ss:$0 sm:$0xff] }
 0x461   :  { %v3899_v1 = vpop.eup %3898  ;;  %3924 = vlog2.f32 %v2171_v59  ;;  %v2179_v56 = vadd.f32 1.0, %v3897_v44 }
 0x462   :  { %v3901_v35 = vpop.eup %3900  ;;  %3926 = vpow2.f32 %v2166_v5 }
 0x463   :  { %v3903_v16 = vpop.eup %3902  ;;  %3928 = vlog2.f32 %v2178_v15  ;;  %v2328_v15 = vmul.f32 %v5194_v25, %v4996_v52  ;;  %v5236_v52 = vmul.f32 %v3899_v1, %v5083_v11 }
 0x464   :  { %v3905_v55 = vpop.eup %3904  ;;  %3930 = vrsqrt.f32 %v2311_v19  ;;  %v2176_v10 = vadd.f32 1.0, %v3903_v16  ;;  %v5229_v19 = vmul.f32 %v3891_v21, %v5059_v37  ;;  %v2330_v16 = vmul.f32 %v3893_v12, %v5002_v17 }
 0x465   :  { %v3907_v58 = vpop.eup %3906  ;;  %3932 = vrsqrt.f32 %v2307_v31  ;;  %v2180_v51 = vadd.f32 1.0, %v3905_v55  ;;  %v5240_v37 = vmul.f32 %v3901_v35, %v5005_v48 }
 0x466   :  { %v3909_v6 = vpop.eup %3908  ;;  %3934 = vlog2.f32 %v2172_v49  ;;  %v2174_v53 = vadd.f32 1.0, %v3907_v58 }
 0x467   :  { %v3911_v13 = vpop.eup %3910  ;;  %3936 = vlog2.f32 %v2179_v56  ;;  %v2173_v44 = vadd.f32 1.0, %v3909_v6  ;;  %v2303_v56 = vmax.f32 %v5222_v46, 1e-24 }
 0x468   :  { %v3913_v59 = vpop.eup %3912  ;;  %3938 = vrsqrt.f32 %v2300_v41  ;;  %v2189_v12 = vmul.f32 0.6931472, %v3911_v13 }
 0x469   :  { %v3915_v5 = vpop.eup %3914  ;;  %3940 = vrsqrt.f32 %v2301_v29  ;;  %v2181_v49 = vadd.f32 1.0, %v3913_v59 }
 0x46a   :  { %v3917_v47 = vpop.eup %3916  ;;  %3942 = vlog2.f32 %v2176_v10  ;;  %v2185_v21 = vmul.f32 0.6931472, %v3915_v5 }
 0x46b   :  { %v3919_v31 = vpop.eup %3918  ;;  %3944 = vlog2.f32 %v2180_v51  ;;  %v2187_v55 = vmul.f32 0.6931472, %v3917_v47 }
 0x46c   :  { %v3921_v25 = vpop.eup %3920  ;;  %3946 = vrsqrt.f32 %v2302_v40  ;;  %v2182_v35 = vadd.f32 1.0, %v3919_v31  ;;  %v2216_v51 = vsel %vm2104_vm10, %v5140_v34, %v2185_v21  ;;  %v2218_v31 = vsel %vm2106_vm9, %v5137_v28, %v2189_v12 }
 0x46d   :  { %v3923_v4 = vpop.eup %3922  ;;  %3948 = vlog2.f32 %v2173_v44  ;;  %v2203_v48 = vmul.f32 0.6931472, %v3921_v25  ;;  %v2217_v40 = vsel %vm2105_vm12, %v5143_v38, %v2187_v55  ;;  %v5273_v12 = vmul.f32 %v2328_v15, %v2216_v51 }
 0x46e   :  { %v3925_v17 = vpop.eup %3924  ;;  %3950 = vlog2.f32 %v2181_v49  ;;  %v2175_v5 = vadd.f32 1.0, %v3923_v4  ;;  %vm2111_vm9 = vcmp.gt.f32.partialorder %v5209_v50, 20.0  ;;  %vm2119_vm10 = vcmp.gt.f32.partialorder %v5213_v23, 20.0 }
 0x46f   :  { %v3927_v11 = vpop.eup %3926  ;;  %3952 = vlog2.f32 %v2174_v53  ;;  %v2191_v59 = vmul.f32 0.6931472, %v3925_v17  ;;  %v2225_v34 = vsel %vm2113_vm13, %v5167_v57, %v2203_v48  ;;  %v5271_v17 = vmul.f32 %v2329_v27, %v2217_v40 }
 0x470   :  { %v3929_v29 = vpop.eup %3928  ;;  %3954 = vlog2.f32 %v2182_v35  ;;  %v2183_v38 = vadd.f32 1.0, %v3927_v11  ;;  %v5279_v57 = vmul.f32 %v2330_v16, %v2218_v31  ;;  %v5289_v48 = vmul.f32 %v5229_v19, %v2225_v34 }
 0x471   :  { %v2713_v41 = vpop.f32.mrf.mxu0  ;;  %v5253_v13 = vpop.eup %3930  ;;  %3956 = vlog2.f32 %v2175_v5 }
 0x472   :  { %v5245_v1 = vadd.f32 %v3229_v22, %v2713_v41  ;;  %v3933_v44 = vpop.eup %3932  ;;  %v2205_v41 = vmul.f32 0.6931472, %v3929_v29  ;;  %v2219_v29 = vsel %vm2107_vm11, %v5152_v45, %v2191_v59  ;;  %3958 = vlog2.f32 %v2183_v38 }
 0x473   :  { %v3652_v58 = vpop.f32.mrf.mxu0  ;;  %v3935_v53 = vpop.eup %3934  ;;  %3960 = vrsqrt.f32 %v2303_v56  ;;  %vm3044_vm11 = vcmask 254976  }
 0x474   :  { %v2731_v6 = vrot.slane %v5245_v1, %v4700_v0  ;;  %v2719_v10 = vmul.f32 %v5245_v1, %v5245_v1  ;;  %v3937_v21 = vpop.eup %3936  ;;  %v2193_v45 = vmul.f32 0.6931472, %v3935_v53 }
 0x475   :  { %v2716_v47 = vpop.f32.mrf.mxu0  ;;  %v3939_v58 = vpop.eup %3938 }
 0x476   :  { %v2732_v49 = vcombine.high %v2731_v6, %v2731_v6  ;;  %v2739_v22 = vrot.slane %v2731_v6, %v4700_v0  ;;  %v2720_v25 = vsel %vm2482_vm5, %v2719_v10, 0.0  ;;  %v3941_v11 = vpop.eup %3940  ;;  %v2226_v6 = vsel %vm2114_vm14, %v5156_v7, %v2205_v41 }
 0x477   :  { %v3653_v4 = vpop.f32.mrf.mxu0  ;;  %2721 = vadd.xlane.f32.xlu0 %v2720_v25  ;;  %v3943_v35 = vpop.eup %3942  ;;  %v2207_v10 = vmul.f32 0.6931472, %v3937_v21  ;;  %v2339_v7 = vmul.f32 %v3933_v44, %v5092_v36  ;;  %v2332_v19 = vmul.f32 %v3939_v58, %v5008_v63  ;;  %v5305_v31 = vmul.f32 %v5236_v52, %v2226_v6 }
 0x478   :  { %v2746_v55 = vrot.slane %v2732_v49, %v4700_v0  ;;  %v5269_v28 = vrot.slane %v2739_v22, %v4705_v3  ;;  %v3945_v16 = vpop.eup %3944  ;;  %v5308_v49 = vmul.f32 %v5240_v37, %v2219_v29  ;;  %v2220_v46 = vsel %vm2108_vm15, %v5160_v8, %v2193_v45 }
 0x479   :  { %v3947_v47 = vpop.eup %3946  ;;  %v2201_v56 = vmul.f32 0.6931472, %v3943_v35  ;;  %v2227_v25 = vsel %vm2115_vm0, %v5164_v61, %v2207_v10  ;;  %v2209_v53 = vmul.f32 0.6931472, %v3945_v16  ;;  %v2340_v8 = vmul.f32 %v5188_v43, %v4993_v18 }
 0x47a   :  { %v5282_v0 = vrot.slane %v2746_v55, %v4705_v3  ;;  %v2758_v27 = vmul.f32 %v5269_v28, %v5271_v17  ;;  %v2757_v15 = vmul.f32 %v5269_v28, %v5273_v12  ;;  %v2759_v5 = vmul.f32 %v5269_v28, %v5279_v57  ;;  %v3949_v22 = vpop.eup %3948 }
 0x47b   :  { %v3951_v36 = vpop.eup %3950  ;;  %v2760_v52 = vmul.f32 %v5269_v28, %v5308_v49  ;;  %v2336_v61 = vmul.f32 %v5217_v62, %v5050_v60  ;;  %v5324_v34 = vmul.f32 %v2339_v7, %v2227_v25  ;;  %v5326_v38 = vmul.f32 %v2332_v19, %v2220_v46 }
 0x47c   :  { %v2776_v51 = vsel %vm1640_vm1, %v2758_v27, 0.0  ;;  %v2773_v59 = vsel %vm1640_vm1, %v2757_v15, 0.0  ;;  %v2766_v40 = vmul.f32 %v5282_v0, %v5289_v48  ;;  %v2779_v44 = vsel %vm1640_vm1, %v2759_v5, 0.0  ;;  %v3953_v37 = vpop.eup %3952 }
 0x47d   :  { %2777 = vadd.xlane.f32.xlu0 %v2776_v51  ;;  %2774 = vadd.xlane.f32.xlu1 %v2773_v59  ;;  %v2767_v41 = vmul.f32 %v5282_v0, %v5305_v31  ;;  %v2195_v4 = vmul.f32 0.6931472, %v3949_v22  ;;  %v2224_v21 = vsel %vm2112_vm2, %v5171_v14, %v2201_v56  ;;  %v2228_v55 = vsel %vm2116_vm3, %v5180_v39, %v2209_v53  ;;  %v3955_v29 = vpop.eup %3954  ;;  %v5552_v53 = vld [vmem:[#allocation7_spill] sm:$0xff] }
 0x47e   :  { %v2800_v63 = vsel %vm1640_vm1, %v2766_v40, 0.0  ;;  %v2211_v58 = vmul.f32 0.6931472, %v3951_v36  ;;  %v2782_v43 = vsel %vm1640_vm1, %v2760_v52, 0.0  ;;  %v2768_v60 = vmul.f32 %v5282_v0, %v5324_v34  ;;  %v3957_v39 = vpop.eup %3956 }
 0x47f   :  { %v2803_v18 = vsel %vm1640_vm1, %v2767_v41, 0.0  ;;  %v2761_v62 = vmul.f32 %v5269_v28, %v5326_v38  ;;  %v2341_v27 = vmul.f32 %v5199_v30, %v4990_v54  ;;  %v2333_v14 = vmul.f32 %v3941_v11, %v5011_v20  ;;  %v3959_v51 = vpop.eup %3958 }
 0x480   :  { %vm2109_vm5 = vcmp.gt.f32.partialorder %v5184_v2, 20.0  ;;  %v5341_v15 = vmul.f32 %v2340_v8, %v2228_v55  ;;  %v5343_v35 = vmul.f32 %v2336_v61, %v2224_v21  ;;  %v2197_v45 = vmul.f32 0.6931472, %v3953_v37  ;;  %v3961_v40 = vpop.eup %3960 }
 0x481   :  { %2801 = vadd.xlane.f32.xlu0 %v2800_v63  ;;  %2780 = vadd.xlane.f32.xlu1 %v2779_v44  ;;  %v2221_v6 = vsel %vm2109_vm5, %v5184_v2, %v2195_v4  ;;  %v2213_v10 = vmul.f32 0.6931472, %v3955_v29  ;;  %v2229_v16 = vsel %vm2117_vm6, %v5192_v33, %v2211_v58  ;;  %v2806_v54 = vsel %vm1640_vm1, %v2768_v60, 0.0  ;;  %v5553_v63 = vld [vmem:[#allocation6_spill] sm:$0xff]  ;;  %v3842_v29 = vld [vmem:[%s5528_s18 + $0x38] sm:$0xff]  }
 0x482   :  { %v2785_v20 = vsel %vm1640_vm1, %v2761_v62, 0.0  ;;  %v2769_v30 = vmul.f32 %v5282_v0, %v5341_v15  ;;  %v2765_v11 = vmul.f32 %v5282_v0, %v5343_v35  ;;  %v2342_v59 = vmul.f32 %v5215_v24, %v5047_v32  ;;  %3655 = vmatpush3.bf16.msra.mxu1 %v3842_v29  ;;  %v3844_v60 = vld [vmem:[%s5528_s18 + $0x28] sm:$0xff]   ;;  %v3845_v62 = vld [vmem:[%s5528_s18 + $0x20] sm:$0xff]  }
 0x483   :  { %v2334_v2 = vmul.f32 %v3947_v47, %v5053_v9  ;;  %v5358_v33 = vmul.f32 %v2341_v27, %v2229_v16  ;;  %v5360_v5 = vmul.f32 %v2333_v14, %v2221_v6  ;;  %v2222_v7 = vsel %vm2110_vm7, %v5177_v26, %v2197_v45  ;;  %v3846_v27 = vld [vmem:[%s5528_s18 + $0x18] sm:$0xff]   ;;  %v3847_v14 = vld [vmem:[%s5528_s18 + $0x10] sm:$0xff]  }
 0x484   :  { %v2199_v19 = vmul.f32 0.6931472, %v3957_v39  ;;  %v2230_v22 = vsel %vm2118_vm8, %v5202_v42, %v2213_v10  ;;  %v2215_v46 = vmul.f32 0.6931472, %v3959_v51  ;;  %v2809_v56 = vsel %vm1640_vm1, %v2769_v30, 0.0  ;;  %v3848_v39 = vld [vmem:[%s5528_s18 + $0x8] sm:$0xff]  }
 0x485   :  { %2804 = vadd.xlane.f32.xlu0 %v2803_v18  ;;  %2783 = vadd.xlane.f32.xlu1 %v2782_v43  ;;  %v2797_v32 = vsel %vm1640_vm1, %v2765_v11, 0.0  ;;  %v2770_v9 = vmul.f32 %v5282_v0, %v5358_v33  ;;  %v2762_v24 = vmul.f32 %v5269_v28, %v5360_v5  ;;  %v5372_v26 = vmul.f32 %v2342_v59, %v2230_v22  ;;  %v3843_v18 = vld [vmem:[%s5528_s18 + $0x30] sm:$0xff]  }
 0x486   :  { %v5374_v42 = vmul.f32 %v2334_v2, %v2222_v7  ;;  %v2223_v47 = vsel %vm2111_vm9, %v5209_v50, %v2199_v19  ;;  %v2231_v25 = vsel %vm2119_vm10, %v5213_v23, %v2215_v46  ;;  %v2343_v36 = vmul.f32 %v5253_v13, %v5552_v53 }
 0x487   :  { %v2335_v44 = vmul.f32 %v3961_v40, %v5553_v63  ;;  %v2812_v41 = vsel %vm1640_vm1, %v2770_v9, 0.0  ;;  %v2788_v52 = vsel %vm1640_vm1, %v2762_v24, 0.0  ;;  %v2771_v37 = vmul.f32 %v5282_v0, %v5372_v26 }
 0x488   :  { %v2763_v8 = vmul.f32 %v5269_v28, %v5374_v42  ;;  %v5387_v50 = vmul.f32 %v2343_v36, %v2231_v25  ;;  %v5554_v43 = vmov 0.0  }
 0x489   :  { %2807 = vadd.xlane.f32.xlu0 %v2806_v54  ;;  %2786 = vadd.xlane.f32.xlu1 %v2785_v20  ;;  %v5389_v23 = vmul.f32 %v2335_v44, %v2223_v47  ;;  %v2815_v13 = vsel %vm1640_vm1, %v2771_v37, 0.0  ;;  %v5555_v54 = vld [vmem:[#allocation5_spill] sm:$0xff] }
 0x48a   :  { %v2791_v61 = vsel %vm1640_vm1, %v2763_v8, 0.0  ;;  %v2772_v4 = vmul.f32 %v5282_v0, %v5387_v50  ;;  %3656 = vmatprep.subr.bf16.mxu1 %v5554_v43  ;;  %v2828_v20 = vsub.s32 1, %v5555_v54 }
 0x48b   :  { %v2764_v21 = vmul.f32 %v5269_v28, %v5389_v23  ;;  %3657 = vmatpush3.bf16.msra.mxu1 %v3843_v18 }
 0x48c   :  { %v2818_v55 = vsel %vm1640_vm1, %v2772_v4, 0.0  ;;  %3658 = vmatprep.subr.bf16.mxu1 %v5554_v43 }
 0x48d   :  { %2810 = vadd.xlane.f32.xlu0 %v2809_v56  ;;  %2798 = vadd.xlane.f32.xlu1 %v2797_v32  ;;  %v2794_v58 = vsel %vm1640_vm1, %v2764_v21, 0.0 }
 0x48f   :  { %3659 = vmatpush3.bf16.msra.mxu1 %v3844_v60 }
 0x490   :  { %3660 = vmatprep.subr.bf16.mxu1 %v5554_v43 }
 0x491   :  { %2813 = vadd.xlane.f32.xlu0 %v2812_v41  ;;  %2789 = vadd.xlane.f32.xlu1 %v2788_v52 }
 0x493   :  { %3661 = vmatpush3.bf16.msra.mxu1 %v3845_v62 }
 0x494   :  { %3662 = vmatprep.subr.bf16.mxu1 %v5554_v43 }
 0x495   :  { %2816 = vadd.xlane.f32.xlu0 %v2815_v13  ;;  %2792 = vadd.xlane.f32.xlu1 %v2791_v61 }
 0x497   :  { %3663 = vmatpush3.bf16.msra.mxu1 %v3846_v27 }
 0x498   :  { %3664 = vmatprep.subr.bf16.mxu1 %v5554_v43 }
 0x499   :  { %2819 = vadd.xlane.f32.xlu0 %v2818_v55  ;;  %2795 = vadd.xlane.f32.xlu1 %v2794_v58 }
 0x49b   :  { %3665 = vmatpush3.bf16.msra.mxu1 %v3847_v14 }
 0x49c   :  { %3666 = vmatprep.subr.bf16.mxu1 %v5554_v43 }
 0x49f   :  { %3667 = vmatpush3.bf16.msra.mxu1 %v3848_v39 }
 0x4a0   :  { %3668 = vmatprep.subr.bf16.mxu1 %v5554_v43 }
 0x500   :  { %v2722_v45 = vpop.xlane.xlu0 %2721 }
 0x501   :  { %3962 = vrcp.f32 %v2722_v45 }
 0x506   :  { %v2778_v6 = vpop.xlane.xlu0 %2777  ;;  %v2775_v10 = vpop.xlane.xlu1 %2774 }
 0x50a   :  { %v2802_v16 = vpop.xlane.xlu0 %2801  ;;  %v2781_v51 = vpop.xlane.xlu1 %2780 }
 0x50e   :  { %v3963_v30 = vpop.eup %3962  ;;  %v2805_v11 = vpop.xlane.xlu0 %2804 }
 0x50f   :  { %v2784_v59 = vpop.xlane.xlu1 %2783  ;;  %v5429_v2 = vrot.slane %v3963_v30, %v4705_v3  ;;  %v5431_v40 = vrot.slane %v3963_v30, %v2828_v20 }
 0x511   :  { %v2833_v7 = vmul.f32 %v5429_v2, %v2778_v6  ;;  %v2832_v19 = vmul.f32 %v5429_v2, %v2775_v10  ;;  %v2834_v22 = vmul.f32 %v5429_v2, %v2781_v51  ;;  %v2841_v46 = vmul.f32 %v5431_v40, %v2802_v16 }
 0x512   :  { %v2808_v56 = vpop.xlane.xlu0 %2807  ;;  %v2835_v3 = vmul.f32 %v5429_v2, %v2784_v59  ;;  %v2842_v36 = vmul.f32 %v5431_v40, %v2805_v11 }
 0x513   :  { %v2787_v32 = vpop.xlane.xlu1 %2786  ;;  %v2849_v9 = vmul.f32 %v2833_v7, %v5269_v28  ;;  %v2848_v24 = vmul.f32 %v2832_v19, %v5269_v28  ;;  %v2850_v47 = vmul.f32 %v2834_v22, %v5269_v28  ;;  %v2857_v63 = vmul.f32 %v2841_v46, %v5282_v0 }
 0x514   :  { %v2843_v44 = vmul.f32 %v5431_v40, %v2808_v56  ;;  %v2836_v41 = vmul.f32 %v5429_v2, %v2787_v32 }
 0x515   :  { %v2865_v25 = vsub.f32 %v5271_v17, %v2849_v9  ;;  %v2864_v53 = vsub.f32 %v5273_v12, %v2848_v24  ;;  %v2866_v61 = vsub.f32 %v5279_v57, %v2850_v47  ;;  %v2851_v17 = vmul.f32 %v2835_v3, %v5269_v28 }
 0x516   :  { %v2811_v52 = vpop.xlane.xlu0 %2810  ;;  %v2858_v12 = vmul.f32 %v2842_v36, %v5282_v0  ;;  %v2873_v58 = vsub.f32 %v5289_v48, %v2857_v63  ;;  %v2859_v29 = vmul.f32 %v2843_v44, %v5282_v0  ;;  %v2852_v18 = vmul.f32 %v2836_v41, %v5269_v28 }
 0x517   :  { %v2799_v37 = vpop.xlane.xlu1 %2798  ;;  %v2881_v8 = vsel %vm1640_vm1, %v2865_v25, 0.0  ;;  %v2880_v13 = vsel %vm1640_vm1, %v2864_v53, 0.0  ;;  %v2844_v21 = vmul.f32 %v5431_v40, %v2811_v52  ;;  %v2883_v62 = vsel %vm1640_vm1, %v2866_v61, 0.0 }
 0x518   :  { %v2882_v4 = vadd.f32 %v2881_v8, %v2880_v13  ;;  %v2840_v55 = vmul.f32 %v5431_v40, %v2799_v37  ;;  %v2867_v57 = vsub.f32 %v5308_v49, %v2851_v17  ;;  %v2874_v6 = vsub.f32 %v5305_v31, %v2858_v12 }
 0x519   :  { %v2860_v48 = vmul.f32 %v2844_v21, %v5282_v0  ;;  %v2902_v16 = vsel %vm1640_vm1, %v2873_v58, 0.0  ;;  %v2875_v51 = vsub.f32 %v5324_v34, %v2859_v29  ;;  %v2868_v54 = vsub.f32 %v5326_v38, %v2852_v18 }
 0x51a   :  { %v2814_v43 = vpop.xlane.xlu0 %2813  ;;  %v2856_v27 = vmul.f32 %v2840_v55, %v5282_v0  ;;  %v2884_v39 = vadd.f32 %v2883_v62, %v2882_v4  ;;  %v2885_v11 = vsel %vm1640_vm1, %v2867_v57, 0.0  ;;  %v2904_v38 = vsel %vm1640_vm1, %v2874_v6, 0.0 }
 0x51b   :  { %v2790_v60 = vpop.xlane.xlu1 %2789  ;;  %v2845_v14 = vmul.f32 %v5431_v40, %v2814_v43  ;;  %v2876_v46 = vsub.f32 %v5341_v15, %v2860_v48  ;;  %v2906_v32 = vsel %vm1640_vm1, %v2875_v51, 0.0  ;;  %v2887_v9 = vsel %vm1640_vm1, %v2868_v54, 0.0 }
 0x51c   :  { %v2837_v45 = vmul.f32 %v5429_v2, %v2790_v60  ;;  %v2872_v10 = vsub.f32 %v5343_v35, %v2856_v27  ;;  %v2886_v19 = vadd.f32 %v2885_v11, %v2884_v39 }
 0x51d   :  { %v2861_v31 = vmul.f32 %v2845_v14, %v5282_v0  ;;  %v2908_v52 = vsel %vm1640_vm1, %v2876_v46, 0.0 }
 0x51e   :  { %v2853_v49 = vmul.f32 %v2837_v45, %v5269_v28  ;;  %v2817_v20 = vpop.xlane.xlu0 %2816  ;;  %v2901_v59 = vsel %vm1640_vm1, %v2872_v10, 0.0  ;;  %v2888_v15 = vadd.f32 %v2887_v9, %v2886_v19 }
 0x51f   :  { %v2793_v30 = vpop.xlane.xlu1 %2792  ;;  %v2846_v7 = vmul.f32 %v5431_v40, %v2817_v20  ;;  %v2903_v35 = vadd.f32 %v2902_v16, %v2901_v59  ;;  %v2877_v53 = vsub.f32 %v5358_v33, %v2861_v31  ;;  %v3235_v20 = vld [vmem:[%s5529_s19] ss:$0 sm:$0xff] }
 0x520   :  { %v2869_v22 = vsub.f32 %v5360_v5, %v2853_v49  ;;  %v2838_v34 = vmul.f32 %v5429_v2, %v2793_v30 }
 0x521   :  { %v2862_v56 = vmul.f32 %v2846_v7, %v5282_v0  ;;  %v2905_v24 = vadd.f32 %v2904_v38, %v2903_v35 }
 0x522   :  { %v2854_v47 = vmul.f32 %v2838_v34, %v5269_v28  ;;  %v2820_v3 = vpop.xlane.xlu0 %2819  ;;  %v2889_v5 = vsel %vm1640_vm1, %v2869_v22, 0.0 }
 0x523   :  { %v2796_v25 = vpop.xlane.xlu1 %2795  ;;  %v2847_v36 = vmul.f32 %v5431_v40, %v2820_v3  ;;  %v2907_v44 = vadd.f32 %v2906_v32, %v2905_v24  ;;  %v2878_v37 = vsub.f32 %v5372_v26, %v2862_v56  ;;  %v2890_v33 = vadd.f32 %v2889_v5, %v2888_v15 }
 0x524   :  { %v2839_v63 = vmul.f32 %v5429_v2, %v2796_v25  ;;  %v2870_v41 = vsub.f32 %v5374_v42, %v2854_v47  ;;  %v2910_v40 = vsel %vm1640_vm1, %v2877_v53, 0.0 }
 0x525   :  { %v2863_v8 = vmul.f32 %v2847_v36, %v5282_v0  ;;  %v2909_v61 = vadd.f32 %v2908_v52, %v2907_v44  ;;  %v2912_v21 = vsel %vm1640_vm1, %v2878_v37, 0.0 }
 0x526   :  { %v2855_v13 = vmul.f32 %v2839_v63, %v5269_v28  ;;  %v2891_v17 = vsel %vm1640_vm1, %v2870_v41, 0.0 }
 0x527   :  { %v2879_v2 = vsub.f32 %v5387_v50, %v2863_v8  ;;  %v2911_v12 = vadd.f32 %v2910_v40, %v2909_v61  ;;  %v2892_v42 = vadd.f32 %v2891_v17, %v2890_v33  ;;  %v3849_v50 = vld [vmem:[%s5528_s18] sm:$0xff]  }
 0x528   :  { %v2871_v4 = vsub.f32 %v5389_v23, %v2855_v13  ;;  %3669 = vmatpush3.bf16.msra.mxu1 %v3849_v50 }
 0x529   :  { %v2914_v26 = vsel %vm1640_vm1, %v2879_v2, 0.0  ;;  %v2913_v55 = vadd.f32 %v2912_v21, %v2911_v12 }
 0x52a   :  { %v2893_v0 = vsel %vm1640_vm1, %v2871_v4, 0.0 }
 0x52b   :  { %v2894_v28 = vadd.f32 %v2893_v0, %v2892_v42  ;;  %v2915_v58 = vadd.f32 %v2914_v26, %v2913_v55 }
 0x52d   :  { %v2895_v29 = vrot.slane %v2894_v28, 4  ;;  %v2916_v18 = vrot.slane %v2915_v58, 4 }
 0x52f   :  { %v2896_v43 = vadd.f32 %v2895_v29, %v2894_v28  ;;  %v2917_v60 = vadd.f32 %v2916_v18, %v2915_v58 }
 0x531   :  { %v2897_v62 = vrot.slane %v2896_v43, 2  ;;  %v2918_v57 = vrot.slane %v2917_v60, 2 }
 0x533   :  { %v2898_v23 = vadd.f32 %v2897_v62, %v2896_v43  ;;  %v2919_v14 = vadd.f32 %v2918_v57, %v2917_v60 }
 0x535   :  { %v2899_v27 = vrot.slane %v2898_v23, 1  ;;  %v2920_v45 = vrot.slane %v2919_v14, 1 }
 0x537   :  { %v2900_v39 = vadd.f32 %v2899_v27, %v2898_v23  ;;  %v2921_v6 = vadd.f32 %v2920_v45, %v2919_v14 }
 0x539   :  { %v2923_v48 = vmul.f32 0.015625, %v2900_v39  ;;  %v2924_v10 = vmul.f32 0.015625, %v2921_v6 }
 0x53b   :  { %v2927_v16 = vsel %vm2479_vm4, %v2924_v10, %v2923_v48 }
 0x53c   :  { %2928 = vrot.lane.b32.xlu1 %v2927_v16, %s3988_s7  ;;  %s3964_s7 = scalar_lea.vmem %s3053_s25, 32 }
 0x53d   :  { %p3965_p0 = scmp.ne.s32.totalorder %s3053_s25, %s3964_s7  ;;  %p3970_p2 = scmp.lt.s32.totalorder %s3964_s7, %s3964_s7 }
 0x53f   :  { %p3971_p3 = por %p3970_p2, %p3969_p1 }
 0x541   :  { %p3972_p4 = pnand %p3971_p3, %p3965_p0 }
 0x5ae   :  { %v2929_v51 = vpop.permute.xlu1 %2928 }
 0x5af   :  { %v2931_v54 = vsel %vm1640_vm1, %v5245_v1, %v2929_v51 }
 0x5b0   :  { %v2932_v49 = vpack.c.bf16 %v2931_v54, %v2931_v54 }
 0x5b2   :  { %3671 = vmatmul.mubr.bf16.vlgmr.msra.gmra.mxu1 %v2932_v49 }
 0x672   :  { %v3038_v30 = vpop.f32.mrf.mxu1 }
 0x673   :  { %v3039_v11 = vadd.f32 %v3235_v20, %v3038_v30 }
 0x674   :  { %v3672_v59 = vpop.f32.mrf.mxu1 }
 0x675   :  { %3045 = vst.msk [vmem:[#allocation2] sm:$0x3] %vm3044_vm11, %v3039_v11 }
 0x676   :  { %v3041_v31 = vpop.f32.mrf.mxu1 }
 0x677   :  { %3975 = shalt.err (!%p3972_p4)
}
 0x678   :  { %3055 = dma.vmem_to_hbm [thread:$0]  %s3053_s25, 32, %s5530_s20, [#allocation3]   ;;  %v3673_v1 = vpop.f32.mrf.mxu1 }
 0x679   :  { %3984 = dma.done.wait [#allocation3], 32  }
 0x67a   :  { %3985 = vsyncadd [#allocation3], 4294967264 }
 0x67b   :  { %3059 = vsyncpa [#allocation3], 1 }

</bundles_post_ra>
